<compile_context>
chip_gen: v7x
topology: tpu7x:2x2x1
jax: 0.10.0
libtpu: 0.0.40
codegen_flags: <defaults>
</compile_context>

<pallas_src>
import numpy as np
import jax
import jax.numpy as jnp
from jax.experimental import pallas as pl
from jax.experimental.pallas import tpu as pltpu

CLIP = 1.0e5  # activation_clip_value (do_activation_clip defaults to False,
              # so only nan_to_num uses it)


def _nan_to_num(x):
    return jnp.nan_to_num(x, nan=0.0, posinf=CLIP, neginf=-CLIP)


# ---------------------------------------------------------------------------
# Fused kernel: GCN (all timesteps) -> LSTM -> fc_out -> L scatter -> L @ L^T
# ---------------------------------------------------------------------------
def fused_kernel(xsn_ref, a_ref, w1_ref, b1_ref, w2_ref, b2_ref, pool_ref,
                 wih_ref, whh_ref, bl_ref, wfc_ref, bfc_ref,
                 rowm_ref, colsel_ref, out_ref):
    H = w2_ref.shape[0]            # hidden_channels
    S = pool_ref.shape[0]          # seq_len
    GP = wih_ref.shape[1] // 4     # per-gate lane-aligned block width (>=128)

    a = a_ref[...]                 # (S*N, S*N) block-diag normalized adjacency

    # ---- GCN layer 1 (timesteps stacked on the sublane axis) --------------
    h = jnp.dot(xsn_ref[...], w1_ref[...], preferred_element_type=jnp.float32)
    h = jnp.dot(a, h, preferred_element_type=jnp.float32) + b1_ref[...]
    h = jnp.maximum(_nan_to_num(h), 0.0)

    # ---- GCN layer 2 -------------------------------------------------------
    h = jnp.dot(h, w2_ref[...], preferred_element_type=jnp.float32)
    h = jnp.dot(a, h, preferred_element_type=jnp.float32) + b2_ref[...]
    h = jnp.maximum(_nan_to_num(h), 0.0)

    # ---- global_mean_pool per timestep via one pooling matmul -> (S, H) ---
    emb = _nan_to_num(jnp.dot(pool_ref[...], h,
                              preferred_element_type=jnp.float32))

    # ---- LSTM: input projections for all timesteps in one matmul ----------
    # Gate g occupies lanes [g*GP, g*GP + H) -> 128-lane-aligned slices below.
    xproj = (jnp.dot(emb, wih_ref[...], preferred_element_type=jnp.float32)
             + bl_ref[...])                                    # (S, 4*GP)

    whh = whh_ref[...]                                         # (H, 4*GP)
    hstate = jnp.zeros((1, H), jnp.float32)
    cstate = jnp.zeros((1, H), jnp.float32)
    # Statically unrolled recurrence (S is a small compile-time constant);
    # state and gate values stay in vregs.
    for s in range(S):
        g = xproj[s:s + 1, :] + jnp.dot(hstate, whh,
                                        preferred_element_type=jnp.float32)
        i_g = jax.nn.sigmoid(g[:, 0 * GP:0 * GP + H])  # PyTorch order: i,f,g,o
        f_g = jax.nn.sigmoid(g[:, 1 * GP:1 * GP + H])
        g_g = jnp.tanh(g[:, 2 * GP:2 * GP + H])
        o_g = jax.nn.sigmoid(g[:, 3 * GP:3 * GP + H])
        cstate = f_g * cstate + i_g * g_g
        hstate = o_g * jnp.tanh(cstate)

    hstate = _nan_to_num(hstate)              # lstm_out[:, -1, :] / final_h

    # ---- fc_out -> cholesky_vec --------------------------------------------
    chol = _nan_to_num(jnp.dot(hstate, wfc_ref[...],
                               preferred_element_type=jnp.float32)
                       + bfc_ref[...])                         # (1, M)

    # ---- lower-tri scatter: L = (RowMask * chol) @ ColSel -> (N, N) --------
    # L[i, j] = chol[0, tri_index(i, j)] for j <= i, else 0 (row-major order),
    # with no Python loop, no reshape, no scratch.
    row_vals = rowm_ref[...] * chol                            # (N, M)
    L = jnp.dot(row_vals, colsel_ref[...],
                preferred_element_type=jnp.float32)            # (N, N)

    # ---- pred_adj = L @ L^T (contract last dims, no transpose op) ----------
    pred = jax.lax.dot_general(L, L, (((1,), (1,)), ((), ())),
                               preferred_element_type=jnp.float32)
    out_ref[...] = _nan_to_num(pred)


# ---------------------------------------------------------------------------
# One-time host-side parameter layout prep (NOT in the per-call jitted path)
# ---------------------------------------------------------------------------
def prepare_params(a_norm, w1, b1, w2, b2, wih_t, whh_t, b_lstm, wfc, bfc,
                   seq_len):
    a_np = np.asarray(a_norm, np.float32)
    N = a_np.shape[0]
    H = int(np.asarray(w1).shape[1])
    GP = max(128, -(-H // 128) * 128)          # lane-aligned per-gate width
    eye_s = np.eye(seq_len, dtype=np.float32)

    a_blk = np.kron(eye_s, a_np)                                   # (S*N, S*N)
    pool = np.kron(eye_s, np.full((1, N), 1.0 / N, np.float32))    # (S, S*N)

    def pad_gates(w):
        """(rows, 4H) -> (rows, 4*GP) with gate g at columns [g*GP, g*GP+H)."""
        w = np.asarray(w, np.float32)
        out = np.zeros((w.shape[0], 4 * GP), np.float32)
        for g in range(4):
            out[:, g * GP:g * GP + H] = w[:, g * H:(g + 1) * H]
        return out

    M = N * (N + 1) // 2
    rows, cols = np.tril_indices(N)            # row-major == PyTorch loop order
    rowm = np.zeros((N, M), np.float32)
    rowm[rows, np.arange(M)] = 1.0
    colsel = np.zeros((M, N), np.float32)
    colsel[np.arange(M), cols] = 1.0

    to_dev = lambda x: jnp.asarray(np.asarray(x, np.float32))
    return tuple(map(to_dev, (
        a_blk,
        np.asarray(w1, np.float32), np.asarray(b1, np.float32).reshape(1, H),
        np.asarray(w2, np.float32), np.asarray(b2, np.float32).reshape(1, H),
        pool,
        pad_gates(wih_t), pad_gates(whh_t), pad_gates(b_lstm),
        np.asarray(wfc, np.float32), np.asarray(bfc, np.float32).reshape(1, M),
        rowm, colsel)))


@jax.jit
def tgcn_cholesky_forward(x_seq, params):
    """x_seq: (S, N, C) node features; params: output of prepare_params()."""
    (a_blk, w1, b1, w2, b2, pool, wih_p, whh_p, bl_p,
     wfc, bfc, rowm, colsel) = params
    S, N, C = x_seq.shape
    H = w1.shape[1]
    GP = wih_p.shape[1] // 4
    M = wfc.shape[1]
    SN = S * N

    xsn = x_seq.reshape(SN, C).astype(jnp.float32)   # timestep-major stacking

    operands = (xsn, a_blk, w1, b1, w2, b2, pool,
                wih_p, whh_p, bl_p, wfc, bfc, rowm, colsel)

    flops = int(2 * SN * C * H + 4 * SN * SN * H + 2 * SN * H * H
                + 2 * S * SN * H + 2 * S * H * 4 * GP + S * 2 * H * 4 * GP
                + 2 * H * M + 2 * N * M * N + 2 * N * N * N)
    transcendentals = int(S * 5 * H)
    bytes_accessed = int(sum(int(np.prod(o.shape)) for o in operands) * 4
                         + N * N * 4)

    vmem_spec = pl.BlockSpec(memory_space=pltpu.MemorySpace.VMEM)
    return pl.pallas_call(
        fused_kernel,
        out_shape=jax.ShapeDtypeStruct((N, N), jnp.float32),
        in_specs=[vmem_spec] * len(operands),
        out_specs=vmem_spec,
        cost_estimate=pl.CostEstimate(flops=flops,
                                      transcendentals=transcendentals,
                                      bytes_accessed=bytes_accessed),
    )(*operands)


# ---------------------------------------------------------------------------
if __name__ == "__main__":
    in_channels, hidden, num_nodes, seq_len = 4, 32, 8, 4
    M = num_nodes * (num_nodes + 1) // 2       # 36 lower-tri elements

    key = jax.random.PRNGKey(0)
    keys = jax.random.split(key, 10)

    # Node features for each timestep's graph.
    x_seq = jax.random.normal(keys[0], (seq_len, num_nodes, in_channels),
                              jnp.float32)

    # Deterministic ring graph with edge weights; GCN normalization with added
    # self-loops: A_norm = D^-1/2 (A + I) D^-1/2  (graph-structure setup glue).
    src = np.arange(num_nodes)
    dst = (src + 1) % num_nodes
    ew = 1.0 + 0.1 * np.arange(num_nodes, dtype=np.float32)
    A = np.zeros((num_nodes, num_nodes), np.float32)
    A[src, dst] += ew
    A[dst, src] += ew
    A_hat = A + np.eye(num_nodes, dtype=np.float32)
    d_inv_sqrt = 1.0 / np.sqrt(A_hat.sum(axis=1))
    a_norm = A_hat * d_inv_sqrt[:, None] * d_inv_sqrt[None, :]

    def init(k, shape, scale=0.1):
        return scale * jax.random.normal(k, shape, jnp.float32)

    # GCN parameters (GCNConv: linear (no bias), propagation, bias added after).
    w1 = init(keys[1], (in_channels, hidden))
    b1 = init(keys[2], (1, hidden))
    w2 = init(keys[3], (hidden, hidden))
    b2 = init(keys[4], (1, hidden))
    # LSTM parameters: W_ih^T, W_hh^T, combined bias b_ih + b_hh, gate order i,f,g,o.
    wih_t = init(keys[5], (hidden, 4 * hidden))
    whh_t = init(keys[6], (hidden, 4 * hidden))
    b_lstm = init(keys[7], (1, 4 * hidden))
    # fc_out parameters.
    wfc = init(keys[8], (hidden, M))
    bfc = init(keys[9], (1, M))

    # One-time host-side layout prep (kron'd adjacency, pooling matrix,
    # lane-aligned gate padding, tri-scatter selection matrices).
    params = prepare_params(a_norm, w1, b1, w2, b2, wih_t, whh_t, b_lstm,
                            wfc, bfc, seq_len)

    pred_adj = tgcn_cholesky_forward(x_seq, params)
    jax.block_until_ready(pred_adj)
    assert pred_adj.shape == (num_nodes, num_nodes)
    print("KERNEL_OK")
</pallas_src>

<mosaic_0001>
module attributes {stable_mosaic.version = 11 : i64} {
  func.func @fused_kernel(%arg0: memref<32x4xf32, #tpu.memory_space<vmem>>, %arg1: memref<32x32xf32, #tpu.memory_space<vmem>>, %arg2: memref<4x32xf32, #tpu.memory_space<vmem>>, %arg3: memref<1x32xf32, #tpu.memory_space<vmem>>, %arg4: memref<32x32xf32, #tpu.memory_space<vmem>>, %arg5: memref<1x32xf32, #tpu.memory_space<vmem>>, %arg6: memref<4x32xf32, #tpu.memory_space<vmem>>, %arg7: memref<32x512xf32, #tpu.memory_space<vmem>>, %arg8: memref<32x512xf32, #tpu.memory_space<vmem>>, %arg9: memref<1x512xf32, #tpu.memory_space<vmem>>, %arg10: memref<32x36xf32, #tpu.memory_space<vmem>>, %arg11: memref<1x36xf32, #tpu.memory_space<vmem>>, %arg12: memref<8x36xf32, #tpu.memory_space<vmem>>, %arg13: memref<36x8xf32, #tpu.memory_space<vmem>>, %arg14: memref<8x8xf32, #tpu.memory_space<vmem>>) attributes {dimension_semantics = [], scalar_prefetch = 0 : i64, scratch_operands = 0 : i64, tpu.core_type = #tpu.core_type<tc>} {
    %c0 = arith.constant 0 : index
    %c0_0 = arith.constant 0 : index
    %0 = vector.load %arg1[%c0, %c0_0] : memref<32x32xf32, #tpu.memory_space<vmem>>, vector<32x32xf32>
    %c0_1 = arith.constant 0 : index
    %c0_2 = arith.constant 0 : index
    %1 = vector.load %arg0[%c0_1, %c0_2] : memref<32x4xf32, #tpu.memory_space<vmem>>, vector<32x4xf32>
    %c0_3 = arith.constant 0 : index
    %c0_4 = arith.constant 0 : index
    %2 = vector.load %arg2[%c0_3, %c0_4] : memref<4x32xf32, #tpu.memory_space<vmem>>, vector<4x32xf32>
    %cst = arith.constant dense<0.000000e+00> : vector<32x32xf32>
    %3 = tpu.matmul %1, %2, %cst {dimension_numbers = #tpu.dot_dimension_numbers<[1], [0], [0], [1], [0, 0, 1, 1], [], []>} : vector<32x4xf32>, vector<4x32xf32>, vector<32x32xf32> -> vector<32x32xf32>
    %cst_5 = arith.constant dense<0.000000e+00> : vector<32x32xf32>
    %4 = tpu.matmul %0, %3, %cst_5 {dimension_numbers = #tpu.dot_dimension_numbers<[1], [0], [0], [1], [0, 0, 1, 1], [], []>} : vector<32x32xf32>, vector<32x32xf32>, vector<32x32xf32> -> vector<32x32xf32>
    %c0_6 = arith.constant 0 : index
    %c0_7 = arith.constant 0 : index
    %5 = vector.load %arg3[%c0_6, %c0_7] : memref<1x32xf32, #tpu.memory_space<vmem>>, vector<1x32xf32>
    %6 = vector.broadcast %5 : vector<1x32xf32> to vector<32x32xf32>
    %7 = arith.addf %4, %6 : vector<32x32xf32>
    %cst_8 = arith.constant 0.000000e+00 : f32
    %cst_9 = arith.constant -1.000000e+05 : f32
    %cst_10 = arith.constant 1.000000e+05 : f32
    %8 = arith.cmpf one, %7, %7 : vector<32x32xf32>
    %9 = vector.broadcast %cst_8 : f32 to vector<32x32xf32>
    %10 = arith.select %8, %9, %7 : vector<32x32xi1>, vector<32x32xf32>
    %cst_11 = arith.constant 0x7F800000 : f32
    %11 = vector.broadcast %cst_11 : f32 to vector<32x32xf32>
    %12 = arith.cmpf oeq, %10, %11 : vector<32x32xf32>
    %13 = vector.broadcast %cst_10 : f32 to vector<32x32xf32>
    %14 = arith.select %12, %13, %10 : vector<32x32xi1>, vector<32x32xf32>
    %cst_12 = arith.constant 0xFF800000 : f32
    %15 = vector.broadcast %cst_12 : f32 to vector<32x32xf32>
    %16 = arith.cmpf oeq, %14, %15 : vector<32x32xf32>
    %17 = vector.broadcast %cst_9 : f32 to vector<32x32xf32>
    %18 = arith.select %16, %17, %14 : vector<32x32xi1>, vector<32x32xf32>
    %cst_13 = arith.constant 0.000000e+00 : f32
    %19 = vector.broadcast %cst_13 : f32 to vector<32x32xf32>
    %20 = arith.maximumf %18, %19 : vector<32x32xf32>
    %c0_14 = arith.constant 0 : index
    %c0_15 = arith.constant 0 : index
    %21 = vector.load %arg4[%c0_14, %c0_15] : memref<32x32xf32, #tpu.memory_space<vmem>>, vector<32x32xf32>
    %cst_16 = arith.constant dense<0.000000e+00> : vector<32x32xf32>
    %22 = tpu.matmul %20, %21, %cst_16 {dimension_numbers = #tpu.dot_dimension_numbers<[1], [0], [0], [1], [0, 0, 1, 1], [], []>} : vector<32x32xf32>, vector<32x32xf32>, vector<32x32xf32> -> vector<32x32xf32>
    %cst_17 = arith.constant dense<0.000000e+00> : vector<32x32xf32>
    %23 = tpu.matmul %0, %22, %cst_17 {dimension_numbers = #tpu.dot_dimension_numbers<[1], [0], [0], [1], [0, 0, 1, 1], [], []>} : vector<32x32xf32>, vector<32x32xf32>, vector<32x32xf32> -> vector<32x32xf32>
    %c0_18 = arith.constant 0 : index
    %c0_19 = arith.constant 0 : index
    %24 = vector.load %arg5[%c0_18, %c0_19] : memref<1x32xf32, #tpu.memory_space<vmem>>, vector<1x32xf32>
    %25 = vector.broadcast %24 : vector<1x32xf32> to vector<32x32xf32>
    %26 = arith.addf %23, %25 : vector<32x32xf32>
    %cst_20 = arith.constant 0.000000e+00 : f32
    %cst_21 = arith.constant -1.000000e+05 : f32
    %cst_22 = arith.constant 1.000000e+05 : f32
    %27 = arith.cmpf one, %26, %26 : vector<32x32xf32>
    %28 = vector.broadcast %cst_20 : f32 to vector<32x32xf32>
    %29 = arith.select %27, %28, %26 : vector<32x32xi1>, vector<32x32xf32>
    %cst_23 = arith.constant 0x7F800000 : f32
    %30 = vector.broadcast %cst_23 : f32 to vector<32x32xf32>
    %31 = arith.cmpf oeq, %29, %30 : vector<32x32xf32>
    %32 = vector.broadcast %cst_22 : f32 to vector<32x32xf32>
    %33 = arith.select %31, %32, %29 : vector<32x32xi1>, vector<32x32xf32>
    %cst_24 = arith.constant 0xFF800000 : f32
    %34 = vector.broadcast %cst_24 : f32 to vector<32x32xf32>
    %35 = arith.cmpf oeq, %33, %34 : vector<32x32xf32>
    %36 = vector.broadcast %cst_21 : f32 to vector<32x32xf32>
    %37 = arith.select %35, %36, %33 : vector<32x32xi1>, vector<32x32xf32>
    %cst_25 = arith.constant 0.000000e+00 : f32
    %38 = vector.broadcast %cst_25 : f32 to vector<32x32xf32>
    %39 = arith.maximumf %37, %38 : vector<32x32xf32>
    %c0_26 = arith.constant 0 : index
    %c0_27 = arith.constant 0 : index
    %40 = vector.load %arg6[%c0_26, %c0_27] : memref<4x32xf32, #tpu.memory_space<vmem>>, vector<4x32xf32>
    %cst_28 = arith.constant dense<0.000000e+00> : vector<4x32xf32>
    %41 = tpu.matmul %40, %39, %cst_28 {dimension_numbers = #tpu.dot_dimension_numbers<[1], [0], [0], [1], [0, 0, 1, 1], [], []>} : vector<4x32xf32>, vector<32x32xf32>, vector<4x32xf32> -> vector<4x32xf32>
    %cst_29 = arith.constant 0.000000e+00 : f32
    %cst_30 = arith.constant -1.000000e+05 : f32
    %cst_31 = arith.constant 1.000000e+05 : f32
    %42 = arith.cmpf one, %41, %41 : vector<4x32xf32>
    %43 = vector.broadcast %cst_29 : f32 to vector<4x32xf32>
    %44 = arith.select %42, %43, %41 : vector<4x32xi1>, vector<4x32xf32>
    %cst_32 = arith.constant 0x7F800000 : f32
    %45 = vector.broadcast %cst_32 : f32 to vector<4x32xf32>
    %46 = arith.cmpf oeq, %44, %45 : vector<4x32xf32>
    %47 = vector.broadcast %cst_31 : f32 to vector<4x32xf32>
    %48 = arith.select %46, %47, %44 : vector<4x32xi1>, vector<4x32xf32>
    %cst_33 = arith.constant 0xFF800000 : f32
    %49 = vector.broadcast %cst_33 : f32 to vector<4x32xf32>
    %50 = arith.cmpf oeq, %48, %49 : vector<4x32xf32>
    %51 = vector.broadcast %cst_30 : f32 to vector<4x32xf32>
    %52 = arith.select %50, %51, %48 : vector<4x32xi1>, vector<4x32xf32>
    %c0_34 = arith.constant 0 : index
    %c0_35 = arith.constant 0 : index
    %53 = vector.load %arg7[%c0_34, %c0_35] : memref<32x512xf32, #tpu.memory_space<vmem>>, vector<32x512xf32>
    %cst_36 = arith.constant dense<0.000000e+00> : vector<4x512xf32>
    %54 = tpu.matmul %52, %53, %cst_36 {dimension_numbers = #tpu.dot_dimension_numbers<[1], [0], [0], [1], [0, 0, 1, 1], [], []>} : vector<4x32xf32>, vector<32x512xf32>, vector<4x512xf32> -> vector<4x512xf32>
    %c0_37 = arith.constant 0 : index
    %c0_38 = arith.constant 0 : index
    %55 = vector.load %arg9[%c0_37, %c0_38] : memref<1x512xf32, #tpu.memory_space<vmem>>, vector<1x512xf32>
    %56 = vector.broadcast %55 : vector<1x512xf32> to vector<4x512xf32>
    %57 = arith.addf %54, %56 : vector<4x512xf32>
    %c0_39 = arith.constant 0 : index
    %c0_40 = arith.constant 0 : index
    %58 = vector.load %arg8[%c0_39, %c0_40] : memref<32x512xf32, #tpu.memory_space<vmem>>, vector<32x512xf32>
    %cst_41 = arith.constant 0.000000e+00 : f32
    %59 = vector.broadcast %cst_41 : f32 to vector<1x32xf32>
    %cst_42 = arith.constant 0.000000e+00 : f32
    %60 = vector.broadcast %cst_42 : f32 to vector<1x32xf32>
    %61 = vector.extract_strided_slice %57 {offsets = [0, 0], sizes = [1, 512], strides = [1, 1]} : vector<4x512xf32> to vector<1x512xf32>
    %cst_43 = arith.constant dense<0.000000e+00> : vector<1x512xf32>
    %62 = tpu.matmul %59, %58, %cst_43 {dimension_numbers = #tpu.dot_dimension_numbers<[1], [0], [0], [1], [0, 0, 1, 1], [], []>} : vector<1x32xf32>, vector<32x512xf32>, vector<1x512xf32> -> vector<1x512xf32>
    %63 = arith.addf %61, %62 : vector<1x512xf32>
    %64 = vector.extract_strided_slice %63 {offsets = [0, 0], sizes = [1, 32], strides = [1, 1]} : vector<1x512xf32> to vector<1x32xf32>
    %65 = arith.negf %64 : vector<1x32xf32>
    %66 = math.exp %65 : vector<1x32xf32>
    %cst_44 = arith.constant 1.000000e+00 : f32
    %67 = vector.broadcast %cst_44 : f32 to vector<1x32xf32>
    %68 = arith.addf %67, %66 : vector<1x32xf32>
    %69 = arith.divf %67, %68 : vector<1x32xf32>
    %70 = vector.extract_strided_slice %63 {offsets = [0, 128], sizes = [1, 32], strides = [1, 1]} : vector<1x512xf32> to vector<1x32xf32>
    %71 = arith.negf %70 : vector<1x32xf32>
    %72 = math.exp %71 : vector<1x32xf32>
    %cst_45 = arith.constant 1.000000e+00 : f32
    %73 = vector.broadcast %cst_45 : f32 to vector<1x32xf32>
    %74 = arith.addf %73, %72 : vector<1x32xf32>
    %75 = arith.divf %73, %74 : vector<1x32xf32>
    %76 = vector.extract_strided_slice %63 {offsets = [0, 256], sizes = [1, 32], strides = [1, 1]} : vector<1x512xf32> to vector<1x32xf32>
    %77 = math.tanh %76 : vector<1x32xf32>
    %78 = vector.extract_strided_slice %63 {offsets = [0, 384], sizes = [1, 32], strides = [1, 1]} : vector<1x512xf32> to vector<1x32xf32>
    %79 = arith.negf %78 : vector<1x32xf32>
    %80 = math.exp %79 : vector<1x32xf32>
    %cst_46 = arith.constant 1.000000e+00 : f32
    %81 = vector.broadcast %cst_46 : f32 to vector<1x32xf32>
    %82 = arith.addf %81, %80 : vector<1x32xf32>
    %83 = arith.divf %81, %82 : vector<1x32xf32>
    %84 = arith.mulf %75, %60 : vector<1x32xf32>
    %85 = arith.mulf %69, %77 : vector<1x32xf32>
    %86 = arith.addf %84, %85 : vector<1x32xf32>
    %87 = math.tanh %86 : vector<1x32xf32>
    %88 = arith.mulf %83, %87 : vector<1x32xf32>
    %89 = vector.extract_strided_slice %57 {offsets = [1, 0], sizes = [1, 512], strides = [1, 1]} : vector<4x512xf32> to vector<1x512xf32>
    %cst_47 = arith.constant dense<0.000000e+00> : vector<1x512xf32>
    %90 = tpu.matmul %88, %58, %cst_47 {dimension_numbers = #tpu.dot_dimension_numbers<[1], [0], [0], [1], [0, 0, 1, 1], [], []>} : vector<1x32xf32>, vector<32x512xf32>, vector<1x512xf32> -> vector<1x512xf32>
    %91 = arith.addf %89, %90 : vector<1x512xf32>
    %92 = vector.extract_strided_slice %91 {offsets = [0, 0], sizes = [1, 32], strides = [1, 1]} : vector<1x512xf32> to vector<1x32xf32>
    %93 = arith.negf %92 : vector<1x32xf32>
    %94 = math.exp %93 : vector<1x32xf32>
    %cst_48 = arith.constant 1.000000e+00 : f32
    %95 = vector.broadcast %cst_48 : f32 to vector<1x32xf32>
    %96 = arith.addf %95, %94 : vector<1x32xf32>
    %97 = arith.divf %95, %96 : vector<1x32xf32>
    %98 = vector.extract_strided_slice %91 {offsets = [0, 128], sizes = [1, 32], strides = [1, 1]} : vector<1x512xf32> to vector<1x32xf32>
    %99 = arith.negf %98 : vector<1x32xf32>
    %100 = math.exp %99 : vector<1x32xf32>
    %cst_49 = arith.constant 1.000000e+00 : f32
    %101 = vector.broadcast %cst_49 : f32 to vector<1x32xf32>
    %102 = arith.addf %101, %100 : vector<1x32xf32>
    %103 = arith.divf %101, %102 : vector<1x32xf32>
    %104 = vector.extract_strided_slice %91 {offsets = [0, 256], sizes = [1, 32], strides = [1, 1]} : vector<1x512xf32> to vector<1x32xf32>
    %105 = math.tanh %104 : vector<1x32xf32>
    %106 = vector.extract_strided_slice %91 {offsets = [0, 384], sizes = [1, 32], strides = [1, 1]} : vector<1x512xf32> to vector<1x32xf32>
    %107 = arith.negf %106 : vector<1x32xf32>
    %108 = math.exp %107 : vector<1x32xf32>
    %cst_50 = arith.constant 1.000000e+00 : f32
    %109 = vector.broadcast %cst_50 : f32 to vector<1x32xf32>
    %110 = arith.addf %109, %108 : vector<1x32xf32>
    %111 = arith.divf %109, %110 : vector<1x32xf32>
    %112 = arith.mulf %103, %86 : vector<1x32xf32>
    %113 = arith.mulf %97, %105 : vector<1x32xf32>
    %114 = arith.addf %112, %113 : vector<1x32xf32>
    %115 = math.tanh %114 : vector<1x32xf32>
    %116 = arith.mulf %111, %115 : vector<1x32xf32>
    %117 = vector.extract_strided_slice %57 {offsets = [2, 0], sizes = [1, 512], strides = [1, 1]} : vector<4x512xf32> to vector<1x512xf32>
    %cst_51 = arith.constant dense<0.000000e+00> : vector<1x512xf32>
    %118 = tpu.matmul %116, %58, %cst_51 {dimension_numbers = #tpu.dot_dimension_numbers<[1], [0], [0], [1], [0, 0, 1, 1], [], []>} : vector<1x32xf32>, vector<32x512xf32>, vector<1x512xf32> -> vector<1x512xf32>
    %119 = arith.addf %117, %118 : vector<1x512xf32>
    %120 = vector.extract_strided_slice %119 {offsets = [0, 0], sizes = [1, 32], strides = [1, 1]} : vector<1x512xf32> to vector<1x32xf32>
    %121 = arith.negf %120 : vector<1x32xf32>
    %122 = math.exp %121 : vector<1x32xf32>
    %cst_52 = arith.constant 1.000000e+00 : f32
    %123 = vector.broadcast %cst_52 : f32 to vector<1x32xf32>
    %124 = arith.addf %123, %122 : vector<1x32xf32>
    %125 = arith.divf %123, %124 : vector<1x32xf32>
    %126 = vector.extract_strided_slice %119 {offsets = [0, 128], sizes = [1, 32], strides = [1, 1]} : vector<1x512xf32> to vector<1x32xf32>
    %127 = arith.negf %126 : vector<1x32xf32>
    %128 = math.exp %127 : vector<1x32xf32>
    %cst_53 = arith.constant 1.000000e+00 : f32
    %129 = vector.broadcast %cst_53 : f32 to vector<1x32xf32>
    %130 = arith.addf %129, %128 : vector<1x32xf32>
    %131 = arith.divf %129, %130 : vector<1x32xf32>
    %132 = vector.extract_strided_slice %119 {offsets = [0, 256], sizes = [1, 32], strides = [1, 1]} : vector<1x512xf32> to vector<1x32xf32>
    %133 = math.tanh %132 : vector<1x32xf32>
    %134 = vector.extract_strided_slice %119 {offsets = [0, 384], sizes = [1, 32], strides = [1, 1]} : vector<1x512xf32> to vector<1x32xf32>
    %135 = arith.negf %134 : vector<1x32xf32>
    %136 = math.exp %135 : vector<1x32xf32>
    %cst_54 = arith.constant 1.000000e+00 : f32
    %137 = vector.broadcast %cst_54 : f32 to vector<1x32xf32>
    %138 = arith.addf %137, %136 : vector<1x32xf32>
    %139 = arith.divf %137, %138 : vector<1x32xf32>
    %140 = arith.mulf %131, %114 : vector<1x32xf32>
    %141 = arith.mulf %125, %133 : vector<1x32xf32>
    %142 = arith.addf %140, %141 : vector<1x32xf32>
    %143 = math.tanh %142 : vector<1x32xf32>
    %144 = arith.mulf %139, %143 : vector<1x32xf32>
    %145 = vector.extract_strided_slice %57 {offsets = [3, 0], sizes = [1, 512], strides = [1, 1]} : vector<4x512xf32> to vector<1x512xf32>
    %cst_55 = arith.constant dense<0.000000e+00> : vector<1x512xf32>
    %146 = tpu.matmul %144, %58, %cst_55 {dimension_numbers = #tpu.dot_dimension_numbers<[1], [0], [0], [1], [0, 0, 1, 1], [], []>} : vector<1x32xf32>, vector<32x512xf32>, vector<1x512xf32> -> vector<1x512xf32>
    %147 = arith.addf %145, %146 : vector<1x512xf32>
    %148 = vector.extract_strided_slice %147 {offsets = [0, 0], sizes = [1, 32], strides = [1, 1]} : vector<1x512xf32> to vector<1x32xf32>
    %149 = arith.negf %148 : vector<1x32xf32>
    %150 = math.exp %149 : vector<1x32xf32>
    %cst_56 = arith.constant 1.000000e+00 : f32
    %151 = vector.broadcast %cst_56 : f32 to vector<1x32xf32>
    %152 = arith.addf %151, %150 : vector<1x32xf32>
    %153 = arith.divf %151, %152 : vector<1x32xf32>
    %154 = vector.extract_strided_slice %147 {offsets = [0, 128], sizes = [1, 32], strides = [1, 1]} : vector<1x512xf32> to vector<1x32xf32>
    %155 = arith.negf %154 : vector<1x32xf32>
    %156 = math.exp %155 : vector<1x32xf32>
    %cst_57 = arith.constant 1.000000e+00 : f32
    %157 = vector.broadcast %cst_57 : f32 to vector<1x32xf32>
    %158 = arith.addf %157, %156 : vector<1x32xf32>
    %159 = arith.divf %157, %158 : vector<1x32xf32>
    %160 = vector.extract_strided_slice %147 {offsets = [0, 256], sizes = [1, 32], strides = [1, 1]} : vector<1x512xf32> to vector<1x32xf32>
    %161 = math.tanh %160 : vector<1x32xf32>
    %162 = vector.extract_strided_slice %147 {offsets = [0, 384], sizes = [1, 32], strides = [1, 1]} : vector<1x512xf32> to vector<1x32xf32>
    %163 = arith.negf %162 : vector<1x32xf32>
    %164 = math.exp %163 : vector<1x32xf32>
    %cst_58 = arith.constant 1.000000e+00 : f32
    %165 = vector.broadcast %cst_58 : f32 to vector<1x32xf32>
    %166 = arith.addf %165, %164 : vector<1x32xf32>
    %167 = arith.divf %165, %166 : vector<1x32xf32>
    %168 = arith.mulf %159, %142 : vector<1x32xf32>
    %169 = arith.mulf %153, %161 : vector<1x32xf32>
    %170 = arith.addf %168, %169 : vector<1x32xf32>
    %171 = math.tanh %170 : vector<1x32xf32>
    %172 = arith.mulf %167, %171 : vector<1x32xf32>
    %cst_59 = arith.constant 0.000000e+00 : f32
    %cst_60 = arith.constant -1.000000e+05 : f32
    %cst_61 = arith.constant 1.000000e+05 : f32
    %173 = arith.cmpf one, %172, %172 : vector<1x32xf32>
    %174 = vector.broadcast %cst_59 : f32 to vector<1x32xf32>
    %175 = arith.select %173, %174, %172 : vector<1x32xi1>, vector<1x32xf32>
    %cst_62 = arith.constant 0x7F800000 : f32
    %176 = vector.broadcast %cst_62 : f32 to vector<1x32xf32>
    %177 = arith.cmpf oeq, %175, %176 : vector<1x32xf32>
    %178 = vector.broadcast %cst_61 : f32 to vector<1x32xf32>
    %179 = arith.select %177, %178, %175 : vector<1x32xi1>, vector<1x32xf32>
    %cst_63 = arith.constant 0xFF800000 : f32
    %180 = vector.broadcast %cst_63 : f32 to vector<1x32xf32>
    %181 = arith.cmpf oeq, %179, %180 : vector<1x32xf32>
    %182 = vector.broadcast %cst_60 : f32 to vector<1x32xf32>
    %183 = arith.select %181, %182, %179 : vector<1x32xi1>, vector<1x32xf32>
    %c0_64 = arith.constant 0 : index
    %c0_65 = arith.constant 0 : index
    %184 = vector.load %arg10[%c0_64, %c0_65] : memref<32x36xf32, #tpu.memory_space<vmem>>, vector<32x36xf32>
    %cst_66 = arith.constant dense<0.000000e+00> : vector<1x36xf32>
    %185 = tpu.matmul %183, %184, %cst_66 {dimension_numbers = #tpu.dot_dimension_numbers<[1], [0], [0], [1], [0, 0, 1, 1], [], []>} : vector<1x32xf32>, vector<32x36xf32>, vector<1x36xf32> -> vector<1x36xf32>
    %c0_67 = arith.constant 0 : index
    %c0_68 = arith.constant 0 : index
    %186 = vector.load %arg11[%c0_67, %c0_68] : memref<1x36xf32, #tpu.memory_space<vmem>>, vector<1x36xf32>
    %187 = arith.addf %185, %186 : vector<1x36xf32>
    %cst_69 = arith.constant 0.000000e+00 : f32
    %cst_70 = arith.constant -1.000000e+05 : f32
    %cst_71 = arith.constant 1.000000e+05 : f32
    %188 = arith.cmpf one, %187, %187 : vector<1x36xf32>
    %189 = vector.broadcast %cst_69 : f32 to vector<1x36xf32>
    %190 = arith.select %188, %189, %187 : vector<1x36xi1>, vector<1x36xf32>
    %cst_72 = arith.constant 0x7F800000 : f32
    %191 = vector.broadcast %cst_72 : f32 to vector<1x36xf32>
    %192 = arith.cmpf oeq, %190, %191 : vector<1x36xf32>
    %193 = vector.broadcast %cst_71 : f32 to vector<1x36xf32>
    %194 = arith.select %192, %193, %190 : vector<1x36xi1>, vector<1x36xf32>
    %cst_73 = arith.constant 0xFF800000 : f32
    %195 = vector.broadcast %cst_73 : f32 to vector<1x36xf32>
    %196 = arith.cmpf oeq, %194, %195 : vector<1x36xf32>
    %197 = vector.broadcast %cst_70 : f32 to vector<1x36xf32>
    %198 = arith.select %196, %197, %194 : vector<1x36xi1>, vector<1x36xf32>
    %c0_74 = arith.constant 0 : index
    %c0_75 = arith.constant 0 : index
    %199 = vector.load %arg12[%c0_74, %c0_75] : memref<8x36xf32, #tpu.memory_space<vmem>>, vector<8x36xf32>
    %200 = vector.broadcast %198 : vector<1x36xf32> to vector<8x36xf32>
    %201 = arith.mulf %199, %200 : vector<8x36xf32>
    %c0_76 = arith.constant 0 : index
    %c0_77 = arith.constant 0 : index
    %202 = vector.load %arg13[%c0_76, %c0_77] : memref<36x8xf32, #tpu.memory_space<vmem>>, vector<36x8xf32>
    %cst_78 = arith.constant dense<0.000000e+00> : vector<8x8xf32>
    %203 = tpu.matmul %201, %202, %cst_78 {dimension_numbers = #tpu.dot_dimension_numbers<[1], [0], [0], [1], [0, 0, 1, 1], [], []>} : vector<8x36xf32>, vector<36x8xf32>, vector<8x8xf32> -> vector<8x8xf32>
    %cst_79 = arith.constant dense<0.000000e+00> : vector<8x8xf32>
    %204 = tpu.matmul %203, %203, %cst_79 {dimension_numbers = #tpu.dot_dimension_numbers<[1], [1], [0], [0], [0, 0, 1, 0], [], []>} : vector<8x8xf32>, vector<8x8xf32>, vector<8x8xf32> -> vector<8x8xf32>
    %cst_80 = arith.constant 0.000000e+00 : f32
    %cst_81 = arith.constant -1.000000e+05 : f32
    %cst_82 = arith.constant 1.000000e+05 : f32
    %205 = arith.cmpf one, %204, %204 : vector<8x8xf32>
    %206 = vector.broadcast %cst_80 : f32 to vector<8x8xf32>
    %207 = arith.select %205, %206, %204 : vector<8x8xi1>, vector<8x8xf32>
    %cst_83 = arith.constant 0x7F800000 : f32
    %208 = vector.broadcast %cst_83 : f32 to vector<8x8xf32>
    %209 = arith.cmpf oeq, %207, %208 : vector<8x8xf32>
    %210 = vector.broadcast %cst_82 : f32 to vector<8x8xf32>
    %211 = arith.select %209, %210, %207 : vector<8x8xi1>, vector<8x8xf32>
    %cst_84 = arith.constant 0xFF800000 : f32
    %212 = vector.broadcast %cst_84 : f32 to vector<8x8xf32>
    %213 = arith.cmpf oeq, %211, %212 : vector<8x8xf32>
    %214 = vector.broadcast %cst_81 : f32 to vector<8x8xf32>
    %215 = arith.select %213, %214, %211 : vector<8x8xi1>, vector<8x8xf32>
    %c0_85 = arith.constant 0 : index
    %c0_86 = arith.constant 0 : index
    %216 = vector.load %arg14[%c0_85, %c0_86] : memref<8x8xf32, #tpu.memory_space<vmem>>, vector<8x8xf32>
    tpu.vector_store %arg14[%c0_85, %c0_86], %215 {strides = array<i32>} : memref<8x8xf32, #tpu.memory_space<vmem>>, vector<8x8xf32>,
    return
  }
}

</mosaic_0001>

<bundles_post_ra>
// kernel: tgcn_cholesky_forward.1
= control target key start
LH: loop header
LB: loop body
LE: loop exit
PB: predicated region body
PF: predicated region fallthrough
CT: control target
= control target key end

     0   :  { %19 = vsyncpa [#allocation3], 0  ;;  %s2991_s0 = inlined_call_operand.vmem [shape: f32[32,4], index: 0, kind: input, shape index: {}]   ;;  %s2992_s1 = inlined_call_operand.hbm [shape: f32[32,32], index: 1, kind: input, shape index: {}]   ;;  %s2993_s2 = inlined_call_operand.hbm [shape: f32[4,32], index: 2, kind: input, shape index: {}]   ;;  %s2994_s3 = inlined_call_operand.vmem [shape: f32[1,32], index: 3, kind: input, shape index: {}]   ;;  %s2995_s4 = inlined_call_operand.hbm [shape: f32[32,32], index: 4, kind: input, shape index: {}]   ;;  %s2996_s5 = inlined_call_operand.hbm [shape: f32[1,32], index: 5, kind: input, shape index: {}]   ;;  %s2997_s6 = inlined_call_operand.hbm [shape: f32[4,32], index: 6, kind: input, shape index: {}]   ;;  %s2998_s7 = inlined_call_operand.hbm [shape: f32[32,512], index: 7, kind: input, shape index: {}]   ;;  %s2999_s8 = inlined_call_operand.vmem [shape: f32[32,512], index: 8, kind: input, shape index: {}]   ;;  %s3000_s9 = inlined_call_operand.hbm [shape: f32[1,512], index: 9, kind: input, shape index: {}]   ;;  %s3001_s10 = inlined_call_operand.hbm [shape: f32[32,36], index: 10, kind: input, shape index: {}]   ;;  %s3002_s11 = inlined_call_operand.hbm [shape: f32[1,36], index: 11, kind: input, shape index: {}]   ;;  %s3003_s12 = inlined_call_operand.vmem [shape: f32[8,36], index: 12, kind: input, shape index: {}]   ;;  %s3004_s13 = inlined_call_operand.vmem [shape: f32[36,8], index: 13, kind: input, shape index: {}]   ;;  %s3005_s14 = inlined_call_operand.hbm [shape: f32[8,8], index: 14, kind: output, shape index: {}]  }
   0x1   :  { %20 = vsyncpa [#allocation6], 0 }
   0x2   :  { %21 = vsyncpa [#allocation9], 0 }
   0x3   :  { %22 = vsyncpa [#allocation12], 0 }
   0x4   :  { %23 = vsyncpa [#allocation15], 0 }
   0x5   :  { %24 = vsyncpa [#allocation4], 0  ;;  %s2539_s29 = smov [#allocation5]   ;;  %s2540_s15 = smov [#allocation8]  }
   0x6   :  { %s45_s30 = sshll.u32 %s2539_s29, 4  ;;  %s69_s16 = sshll.u32 %s2540_s15, 4  ;;  %s46_s30 = int_to_ptr.vmem [resolvable:$true] %s45_s30  ;;  %s70_s16 = int_to_ptr.vmem [resolvable:$true] %s69_s16 }
   0x7   :  { %s2307_s19 = scalar_lea.hbm %s2993_s2, 64 }
   0x8   :  { %p2308_p0 = scmp.ne.s32.totalorder %s2993_s2, %s2307_s19  ;;  %p2311_p1 = scmp.lt.u32.totalorder %s2307_s19, %s2993_s2 }
   0xa   :  { %p2313_p2 = pnand %p2311_p1, %p2308_p0 }
   0xc   :  { %2316 = shalt.err (!%p2313_p2)
}
   0xd   :  { %s2317_s24 = scalar_lea.vmem %s46_s30, 64  ;;  %p2322_p4 = scmp.lt.s32.totalorder %s46_s30, %s46_s30 }
   0xe   :  { %p2318_p3 = scmp.ne.s32.totalorder %s46_s30, %s2317_s24  ;;  %p2323_p5 = scmp.lt.s32.totalorder %s2317_s24, %s2317_s24 }
  0x10   :  { %p2324_p6 = por %p2323_p5, %p2322_p4 }
  0x12   :  { %p2325_p7 = pnand %p2324_p6, %p2318_p3 }
  0x14   :  { %2328 = shalt.err (!%p2325_p7)
}
  0x15   :  { %48 = dma.hbm_to_vmem [thread:$0]  %s2993_s2, 64, %s46_s30, [#allocation6]  }
  0x16   :  { %s2329_s29 = scalar_lea.hbm %s2996_s5, 16 }
  0x17   :  { %p2330_p8 = scmp.ne.s32.totalorder %s2996_s5, %s2329_s29  ;;  %p2333_p9 = scmp.lt.u32.totalorder %s2329_s29, %s2996_s5 }
  0x19   :  { %p2335_p10 = pnand %p2333_p9, %p2330_p8 }
  0x1b   :  { %2338 = shalt.err (!%p2335_p10)
}
  0x1c   :  { %s2339_s20 = scalar_lea.vmem %s70_s16, 16  ;;  %s2343_s21 = scalar_lea.vmem %s70_s16, 32 }
  0x1d   :  { %p2340_p11 = scmp.ne.s32.totalorder %s70_s16, %s2339_s20  ;;  %p2344_p12 = scmp.lt.s32.totalorder %s70_s16, %s70_s16 }
  0x1e   :  { %p2345_p13 = scmp.lt.s32.totalorder %s2343_s21, %s2339_s20 }
  0x20   :  { %p2346_p0 = por %p2345_p13, %p2344_p12 }
  0x22   :  { %p2347_p1 = pnand %p2346_p0, %p2340_p11 }
  0x24   :  { %2350 = shalt.err (!%p2347_p1)
}
  0x25   :  { %72 = dma.hbm_to_vmem [thread:$0]  %s2996_s5, 16, %s70_s16, [#allocation9]  }
  0x26   :  { %s2541_s22 = smov [#allocation11]   ;;  %s2351_s26 = scalar_lea.hbm %s2998_s7, 2048 }
  0x27   :  { %s88_s23 = sshll.u32 %s2541_s22, 4  ;;  %p2352_p2 = scmp.ne.s32.totalorder %s2998_s7, %s2351_s26  ;;  %s89_s23 = int_to_ptr.vmem [resolvable:$true] %s88_s23 }
  0x28   :  { %p2355_p3 = scmp.lt.u32.totalorder %s2351_s26, %s2998_s7 }
  0x2a   :  { %p2357_p4 = pnand %p2355_p3, %p2352_p2 }
  0x2c   :  { %2360 = shalt.err (!%p2357_p4)
}
  0x2d   :  { %s2361_s17 = scalar_lea.vmem %s89_s23, 2048  ;;  %p2366_p6 = scmp.lt.s32.totalorder %s89_s23, %s89_s23 }
  0x2e   :  { %p2362_p5 = scmp.ne.s32.totalorder %s89_s23, %s2361_s17  ;;  %p2367_p7 = scmp.lt.s32.totalorder %s2361_s17, %s2361_s17 }
  0x30   :  { %p2368_p8 = por %p2367_p7, %p2366_p6 }
  0x32   :  { %p2369_p9 = pnand %p2368_p8, %p2362_p5 }
  0x34   :  { %2372 = shalt.err (!%p2369_p9)
}
  0x35   :  { %s2542_s5 = smov 512   ;;  %s2543_s16 = smov 32  }
  0x36   :  { %94 = dma.hbm_to_vmem [thread:$0]  %s2998_s7, 2048, %s89_s23, [#allocation12], %s2542_s5, %s2542_s5, %s2543_s16  }
  0x37   :  { %s2544_s20 = smov [#allocation14]   ;;  %s2545_s2 = smov [#allocation2]  }
  0x38   :  { %s112_s21 = sshll.u32 %s2544_s20, 4  ;;  %s32_s30 = sshll.u32 %s2545_s2, 4  ;;  %s113_s21 = int_to_ptr.vmem [resolvable:$true] %s112_s21  ;;  %s33_s30 = int_to_ptr.vmem [resolvable:$true] %s32_s30 }
  0x39   :  { %s2373_s25 = scalar_lea.hbm %s3001_s10, 512 }
  0x3a   :  { %p2374_p10 = scmp.ne.s32.totalorder %s3001_s10, %s2373_s25  ;;  %p2377_p11 = scmp.lt.u32.totalorder %s2373_s25, %s3001_s10 }
  0x3c   :  { %p2379_p12 = pnand %p2377_p11, %p2374_p10 }
  0x3e   :  { %2382 = shalt.err (!%p2379_p12)
}
  0x3f   :  { %s2383_s7 = scalar_lea.vmem %s113_s21, 512  ;;  %p2388_p0 = scmp.lt.s32.totalorder %s113_s21, %s113_s21 }
  0x40   :  { %p2384_p13 = scmp.ne.s32.totalorder %s113_s21, %s2383_s7  ;;  %p2389_p1 = scmp.lt.s32.totalorder %s2383_s7, %s2383_s7 }
  0x42   :  { %p2390_p2 = por %p2389_p1, %p2388_p0 }
  0x44   :  { %p2391_p3 = pnand %p2390_p2, %p2384_p13 }
  0x46   :  { %2394 = shalt.err (!%p2391_p3)
}
  0x47   :  { %s2546_s23 = smov 128   ;;  %s2547_s15 = smov 8  }
  0x48   :  { %118 = dma.hbm_to_vmem [thread:$0]  %s3001_s10, 512, %s113_s21, [#allocation15], %s2546_s23, %s2546_s23, %s2547_s15  }
  0x49   :  { %s2395_s19 = scalar_lea.hbm %s2992_s1, 512 }
  0x4a   :  { %p2396_p4 = scmp.ne.s32.totalorder %s2992_s1, %s2395_s19  ;;  %p2399_p5 = scmp.lt.u32.totalorder %s2395_s19, %s2992_s1 }
  0x4c   :  { %p2401_p6 = pnand %p2399_p5, %p2396_p4 }
  0x4e   :  { %2404 = shalt.err (!%p2401_p6)
}
  0x4f   :  { %s2405_s25 = scalar_lea.vmem %s33_s30, 512  ;;  %p2410_p8 = scmp.lt.s32.totalorder %s33_s30, %s33_s30 }
  0x50   :  { %p2406_p7 = scmp.ne.s32.totalorder %s33_s30, %s2405_s25  ;;  %p2411_p9 = scmp.lt.s32.totalorder %s2405_s25, %s2405_s25 }
  0x52   :  { %p2412_p10 = por %p2411_p9, %p2410_p8 }
  0x54   :  { %p2413_p11 = pnand %p2412_p10, %p2406_p7 }
  0x56   :  { %2416 = shalt.err (!%p2413_p11)
}
  0x57   :  { %38 = dma.hbm_to_vmem [thread:$0]  %s2992_s1, 512, %s33_s30, [#allocation3], %s2546_s23, %s2546_s23, %s2547_s15  }
  0x58   :  { %s2548_s26 = smov [#allocation7]   ;;  %s2549_s28 = smov [#allocation10]  }
  0x59   :  { %s56_s27 = sshll.u32 %s2548_s26, 4  ;;  %s79_s29 = sshll.u32 %s2549_s28, 4  ;;  %s57_s27 = int_to_ptr.vmem [resolvable:$true] %s56_s27  ;;  %s80_s29 = int_to_ptr.vmem [resolvable:$true] %s79_s29 }
  0x5a   :  { %s2417_s5 = scalar_lea.hbm %s2995_s4, 512 }
  0x5b   :  { %p2418_p12 = scmp.ne.s32.totalorder %s2995_s4, %s2417_s5  ;;  %p2421_p13 = scmp.lt.u32.totalorder %s2417_s5, %s2995_s4 }
  0x5d   :  { %p2423_p0 = pnand %p2421_p13, %p2418_p12 }
  0x5f   :  { %2426 = shalt.err (!%p2423_p0)
}
  0x60   :  { %s2427_s1 = scalar_lea.vmem %s57_s27, 512  ;;  %p2432_p2 = scmp.lt.s32.totalorder %s57_s27, %s57_s27 }
  0x61   :  { %p2428_p1 = scmp.ne.s32.totalorder %s57_s27, %s2427_s1  ;;  %p2433_p3 = scmp.lt.s32.totalorder %s2427_s1, %s2427_s1 }
  0x63   :  { %p2434_p4 = por %p2433_p3, %p2432_p2 }
  0x65   :  { %p2435_p5 = pnand %p2434_p4, %p2428_p1 }
  0x67   :  { %2438 = shalt.err (!%p2435_p5)
}
  0x68   :  { %62 = dma.hbm_to_vmem [thread:$0]  %s2995_s4, 512, %s57_s27, [#allocation6], %s2546_s23, %s2546_s23, %s2547_s15  }
  0x69   :  { %s2439_s25 = scalar_lea.hbm %s2997_s6, 64 }
  0x6a   :  { %p2440_p6 = scmp.ne.s32.totalorder %s2997_s6, %s2439_s25  ;;  %p2443_p7 = scmp.lt.u32.totalorder %s2439_s25, %s2997_s6 }
  0x6c   :  { %p2445_p8 = pnand %p2443_p7, %p2440_p6 }
  0x6e   :  { %2448 = shalt.err (!%p2445_p8)
}
  0x6f   :  { %s2449_s7 = scalar_lea.vmem %s80_s29, 64  ;;  %p2454_p10 = scmp.lt.s32.totalorder %s80_s29, %s80_s29 }
  0x70   :  { %p2450_p9 = scmp.ne.s32.totalorder %s80_s29, %s2449_s7  ;;  %p2455_p11 = scmp.lt.s32.totalorder %s2449_s7, %s2449_s7 }
  0x72   :  { %p2456_p12 = por %p2455_p11, %p2454_p10 }
  0x74   :  { %p2457_p13 = pnand %p2456_p12, %p2450_p9 }
  0x76   :  { %2460 = shalt.err (!%p2457_p13)
}
  0x77   :  { %82 = dma.hbm_to_vmem [thread:$0]  %s2997_s6, 64, %s80_s29, [#allocation9]  }
  0x78   :  { %s2550_s15 = smov [#allocation13]   ;;  %s2551_s17 = smov [#allocation16]  }
  0x79   :  { %s103_s27 = sshll.u32 %s2550_s15, 4  ;;  %s125_s5 = sshll.u32 %s2551_s17, 4  ;;  %s104_s27 = int_to_ptr.vmem [resolvable:$true] %s103_s27  ;;  %s126_s5 = int_to_ptr.vmem [resolvable:$true] %s125_s5 }
  0x7a   :  { %s2461_s19 = scalar_lea.hbm %s3000_s9, 64 }
  0x7b   :  { %p2462_p0 = scmp.ne.s32.totalorder %s3000_s9, %s2461_s19  ;;  %p2465_p1 = scmp.lt.u32.totalorder %s2461_s19, %s3000_s9 }
  0x7d   :  { %p2467_p2 = pnand %p2465_p1, %p2462_p0 }
  0x7f   :  { %2470 = shalt.err (!%p2467_p2)
}
  0x80   :  { %s2471_s6 = scalar_lea.vmem %s104_s27, 64  ;;  %p2476_p4 = scmp.lt.s32.totalorder %s104_s27, %s104_s27 }
  0x81   :  { %p2472_p3 = scmp.ne.s32.totalorder %s104_s27, %s2471_s6  ;;  %p2477_p5 = scmp.lt.s32.totalorder %s2471_s6, %s2471_s6 }
  0x83   :  { %p2478_p6 = por %p2477_p5, %p2476_p4 }
  0x85   :  { %p2479_p7 = pnand %p2478_p6, %p2472_p3 }
  0x87   :  { %2482 = shalt.err (!%p2479_p7)
}
  0x88   :  { %106 = dma.hbm_to_vmem [thread:$0]  %s3000_s9, 64, %s104_s27, [#allocation12]  }
  0x89   :  { %s2483_s10 = scalar_lea.hbm %s3002_s11, 16 }
  0x8a   :  { %p2484_p8 = scmp.ne.s32.totalorder %s3002_s11, %s2483_s10  ;;  %p2487_p9 = scmp.lt.u32.totalorder %s2483_s10, %s3002_s11 }
  0x8c   :  { %p2489_p10 = pnand %p2487_p9, %p2484_p8 }
  0x8e   :  { %2492 = shalt.err (!%p2489_p10)
}
  0x8f   :  { %s2493_s4 = scalar_lea.vmem %s126_s5, 16  ;;  %s2497_s23 = scalar_lea.vmem %s126_s5, 32 }
  0x90   :  { %p2494_p11 = scmp.ne.s32.totalorder %s126_s5, %s2493_s4  ;;  %p2498_p12 = scmp.lt.s32.totalorder %s126_s5, %s126_s5 }
  0x91   :  { %p2499_p13 = scmp.lt.s32.totalorder %s2497_s23, %s2493_s4 }
  0x93   :  { %p2500_p0 = por %p2499_p13, %p2498_p12 }
  0x95   :  { %p2501_p1 = pnand %p2500_p0, %p2494_p11 }
  0x97   :  { %2504 = shalt.err (!%p2501_p1)
}
  0x98   :  { %128 = dma.hbm_to_vmem [thread:$0]  %s3002_s11, 16, %s126_s5, [#allocation15]  }
  0x99   :  { %2527 = dma.done.wait [#allocation3], 512  }
  0x9a   :  { %2528 = vsyncadd [#allocation3], 4294966784 }
  0x9b   :  { %2529 = dma.done.wait [#allocation6], 576  }
  0x9c   :  { %2530 = vsyncadd [#allocation6], 4294966720 }
  0x9d   :  { %2531 = dma.done.wait [#allocation9], 80  }
  0x9e   :  { %2532 = vsyncadd [#allocation9], 4294967216 }
  0x9f   :  { %2533 = dma.done.wait [#allocation12], 2112  }
  0xa0   :  { %2534 = vsyncadd [#allocation12], 4294965184 }
  0xa1   :  { %2535 = dma.done.wait [#allocation15], 528  }
  0xa2   :  { %2536 = vsyncadd [#allocation15], 4294966768  ;;  %vm182_vm0 = vcmask 1043456   ;;  %vm169_vm1 = vcmask 31744   ;;  %v168_v0 = vld [vmem:[#allocation5] sm:$0xf] }
  0xa3   :  { %v164_v1 = vld [vmem:[%s2991_s0] sm:$0xff]  ;;  %v165_v2 = vld [vmem:[%s2991_s0 + $0x8] sm:$0xff]  ;;  %2014 = vmatprep.subr.msk.mxu0 %vm182_vm0, %v168_v0  ;;  %v166_v3 = vld [vmem:[%s2991_s0 + $0x10] sm:$0xff]  ;;  %vm278_vm2 = vcmask 261120   ;;  %v2552_v52 = vmov 0.0|0.0   ;;  %vm2553_vm15 = vmmov 0  }
  0xa4   :  { %2016 = vmatprep.mubr.msk.f32.mxu0 %vm169_vm1, %v164_v1  ;;  %2015 = vmatpush3.msk.msra.mxu0 %vm182_vm0, %v168_v0  ;;  %v167_v4 = vld [vmem:[%s2991_s0 + $0x18] sm:$0xff]  ;;  %v160_v5 = vld [vmem:[#allocation2] sm:$0xff]  ;;  %v2763_v12 = vld [vmem:[#allocation2 + $0x8] sm:$0xff]  ;;  %v2554_v53 = vmov 0.0  }
  0xa5   :  { %2017 = vmatmul.mubr.msk.f32.vlgmr.msra.gmra.mrb[0].mxu0 %vm169_vm1, %v165_v2  ;;  %2030 = vmatprep.mubr.msk.f32.mxu1 %vm278_vm2, %v160_v5  ;;  %v2765_v13 = vld [vmem:[#allocation2 + $0x10] sm:$0xff]  ;;  %v2771_v14 = vld [vmem:[#allocation2 + $0x18] sm:$0xff]  ;;  %v404_v15 = vld [vmem:[#allocation7] sm:$0xff] }
  0xa6   :  { %2019 = vmatprep.mubr.msk.f32.mxu0 %vm169_vm1, %v166_v3  ;;  %v405_v16 = vld [vmem:[#allocation7 + $0x8] sm:$0xff]  ;;  %v406_v18 = vld [vmem:[#allocation7 + $0x10] sm:$0xff]  ;;  %v407_v19 = vld [vmem:[#allocation7 + $0x18] sm:$0xff] }
  0xa7   :  { %v2112_v17 = vpack.c.bf16 %v405_v16, %v404_v15  ;;  %v2116_v20 = vpack.c.bf16 %v407_v19, %v406_v18  ;;  %v1927_v21 = vld [vmem:[%s2994_s3] ss:$0 sm:$0xff]  ;;  %v706_v54 = vld [vmem:[#allocation11 + $0x8] sm:$0xff]  ;;  %v705_v57 = vld [vmem:[#allocation11] sm:$0xff] }
  0xa8   :  { %v710_v55 = vld [vmem:[#allocation11 + $0x28] sm:$0xff]  ;;  %v709_v58 = vld [vmem:[#allocation11 + $0x20] sm:$0xff]  ;;  %v1936_v60 = vld [vmem:[#allocation8] ss:$0 sm:$0xff] }
  0xa9   :  { %2020 = vmatmul.mubr.msk.f32.gmra.mrb[2].mxu0 %vm169_vm1, %v167_v4  ;;  %2113 = vmatprep.subr.bf16.mxu0 %v2112_v17  ;;  %v2134_v56 = vpack.c.bf16 %v710_v55, %v706_v54  ;;  %v2136_v59 = vpack.c.bf16 %v709_v58, %v705_v57  ;;  %v708_v19 = vld [vmem:[#allocation11 + $0x18] sm:$0xff]  ;;  %v890_v54 = vld [vmem:[%s2999_s8 + $0x10] sm:$0xff] }
  0xaa   :  { %2115 = vmatpush3.bf16.msra.mxu0 %v2112_v17  ;;  %v894_v55 = vld [vmem:[%s2999_s8 + $0x30] sm:$0xff]  ;;  %v901_v58 = vld [vmem:[%s2999_s8 + $0x68] sm:$0xff] }
  0xab   :  { %2117 = vmatprep.subr.bf16.mxu0 %v2116_v20 }
  0xae   :  { %2119 = vmatpush3.bf16.msra.mxu0 %v2116_v20  ;;  %v712_v20 = vld [vmem:[#allocation11 + $0x38] sm:$0xff] }
  0xaf   :  { %2128 = vmatprep.subr.bf16.mxu0 %v2552_v52 }
 0x178   :  { %v2018_v6 = vpop.f32.mrb[0].mxu0 }
 0x179   :  { %v252_v7 = vpop.f32.mrb[1].mxu0 }
 0x17a   :  { %v2104_v8 = vpack.c.bf16 %v2018_v6, %v252_v7 }
 0x17c   :  { %v2021_v9 = vpop.f32.mrb[2].mxu0  ;;  %2105 = vmatprep.subr.bf16.mxu1 %v2104_v8 }
 0x17d   :  { %v262_v10 = vpop.f32.mrb[3].mxu0  ;;  %2107 = vmatpush3.bf16.msra.mxu1 %v2104_v8 }
 0x17e   :  { %v2108_v11 = vpack.c.bf16 %v2021_v9, %v262_v10 }
 0x180   :  { %2109 = vmatprep.subr.bf16.mxu1 %v2108_v11 }
 0x181   :  { %2111 = vmatpush3.bf16.msra.mxu1 %v2108_v11 }
 0x184   :  { %2031 = vmatmul.mubr.msk.f32.vlgmr.msra.gmra.mrb[0].mxu1 %vm278_vm2, %v2763_v12 }
 0x185   :  { %2033 = vmatprep.mubr.msk.f32.mxu1 %vm278_vm2, %v2765_v13 }
 0x188   :  { %2034 = vmatmul.mubr.msk.f32.gmra.mrb[2].mxu1 %vm278_vm2, %v2771_v14 }
 0x189   :  { %2058 = vmatprep.mubr.msk.f32.mxu1 %vm278_vm2, %v160_v5 }
 0x257   :  { %v2032_v22 = vpop.f32.mrb[0].mxu1 }
 0x258   :  { %v363_v23 = vadd.f32 %v2032_v22, %v1927_v21  ;;  %v357_v24 = vpop.f32.mrb[1].mxu1 }
 0x259   :  { %v358_v25 = vadd.f32 %v1927_v21, %v357_v24  ;;  %v2142_v24 = vpack.c.bf16 %v712_v20, %v708_v19 }
 0x25a   :  { %vm377_vm3 = vcmp.ne.f32.partialorder %v363_v23, %v363_v23 }
 0x25b   :  { %v381_v26 = vsel %vm377_vm3, 0.0, %v363_v23  ;;  %vm376_vm4 = vcmp.ne.f32.partialorder %v358_v25, %v358_v25  ;;  %v2035_v27 = vpop.f32.mrb[2].mxu1 }
 0x25c   :  { %vm385_vm5 = vcmp.eq.f32.partialorder %v381_v26, inf  ;;  %v380_v28 = vsel %vm376_vm4, 0.0, %v358_v25  ;;  %v373_v29 = vadd.f32 %v2035_v27, %v1927_v21  ;;  %v367_v30 = vpop.f32.mrb[3].mxu1  ;;  %v707_v25 = vld [vmem:[#allocation11 + $0x10] sm:$0xff] }
 0x25d   :  { %v389_v31 = vsel %vm385_vm5, 100000.0, %v381_v26  ;;  %vm384_vm6 = vcmp.eq.f32.partialorder %v380_v28, inf  ;;  %v368_v32 = vadd.f32 %v1927_v21, %v367_v30  ;;  %v711_v26 = vld [vmem:[#allocation11 + $0x30] sm:$0xff]  ;;  %v714_v30 = vld [vmem:[#allocation11 + $0x48] sm:$0xff] }
 0x25e   :  { %vm393_vm7 = vcmp.eq.f32.partialorder %v389_v31, -inf  ;;  %v388_v33 = vsel %vm384_vm6, 100000.0, %v380_v28  ;;  %vm379_vm8 = vcmp.ne.f32.partialorder %v373_v29, %v373_v29  ;;  %v625_v28 = vld [vmem:[#allocation10] sm:$0xf] }
 0x25f   :  { %v397_v34 = vsel %vm393_vm7, -100000.0, %v389_v31  ;;  %vm392_vm9 = vcmp.eq.f32.partialorder %v388_v33, -inf  ;;  %v383_v35 = vsel %vm379_vm8, 0.0, %v373_v29  ;;  %vm378_vm10 = vcmp.ne.f32.partialorder %v368_v32, %v368_v32  ;;  %v718_v31 = vld [vmem:[#allocation11 + $0x68] sm:$0xff] }
 0x260   :  { %v396_v36 = vsel %vm392_vm9, -100000.0, %v388_v33  ;;  %vm387_vm11 = vcmp.eq.f32.partialorder %v383_v35, inf  ;;  %v382_v37 = vsel %vm378_vm10, 0.0, %v368_v32  ;;  %v401_v40 = vmax.f32 %v397_v34, 0.0  ;;  %v716_v32 = vld [vmem:[#allocation11 + $0x58] sm:$0xff] }
 0x261   :  { %v400_v38 = vmax.f32 %v396_v36, 0.0  ;;  %v391_v39 = vsel %vm387_vm11, 100000.0, %v383_v35  ;;  %vm386_vm12 = vcmp.eq.f32.partialorder %v382_v37, inf  ;;  %v2144_v29 = vpack.c.bf16 %v711_v26, %v707_v25  ;;  %v720_v34 = vld [vmem:[#allocation11 + $0x78] sm:$0xff]  ;;  %v713_v35 = vld [vmem:[#allocation11 + $0x40] sm:$0xff] }
 0x262   :  { %vm395_vm13 = vcmp.eq.f32.partialorder %v391_v39, -inf  ;;  %v390_v41 = vsel %vm386_vm12, 100000.0, %v382_v37  ;;  %v2138_v33 = vpack.c.bf16 %v718_v31, %v714_v30  ;;  %v717_v36 = vld [vmem:[#allocation11 + $0x60] sm:$0xff]  ;;  %v2146_v37 = vpack.c.bf16 %v720_v34, %v716_v32 }
 0x263   :  { %v399_v42 = vsel %vm395_vm13, -100000.0, %v391_v39  ;;  %vm394_vm14 = vcmp.eq.f32.partialorder %v390_v41, -inf  ;;  %2044 = vmatprep.mubr.msk.f32.mxu0 %vm278_vm2, %v400_v38  ;;  %v2140_v38 = vpack.c.bf16 %v717_v36, %v713_v35  ;;  %v715_v39 = vld [vmem:[#allocation11 + $0x50] sm:$0xff] }
 0x264   :  { %v398_v43 = vsel %vm394_vm14, -100000.0, %v390_v41  ;;  %2045 = vmatmul.mubr.msk.f32.vlgmr.msra.gmra.mrb[4].mxu0 %vm278_vm2, %v401_v40  ;;  %v403_v45 = vmax.f32 %v399_v42, 0.0  ;;  %v719_v40 = vld [vmem:[#allocation11 + $0x70] sm:$0xff]  ;;  %v889_v42 = vld [vmem:[%s2999_s8 + $0x8] sm:$0xff] }
 0x265   :  { %v402_v44 = vmax.f32 %v398_v43, 0.0  ;;  %v2148_v41 = vpack.c.bf16 %v719_v40, %v715_v39  ;;  %v893_v43 = vld [vmem:[%s2999_s8 + $0x28] sm:$0xff] }
 0x267   :  { %2047 = vmatprep.mubr.msk.f32.mxu0 %vm278_vm2, %v402_v44  ;;  %v891_v44 = vld [vmem:[%s2999_s8 + $0x18] sm:$0xff] }
 0x268   :  { %2048 = vmatmul.mubr.msk.f32.gmra.mrb[6].mxu0 %vm278_vm2, %v403_v45  ;;  %v2805_v45 = vpack.c.bf16 %v893_v43, %v889_v42 }
 0x269   :  { %2072 = vmatprep.mubr.msk.f32.mxu0 %vm2553_vm15, %v2554_v53 }
 0x337   :  { %v2046_v46 = vpop.f32.mrb[4].mxu0 }
 0x338   :  { %v486_v47 = vpop.f32.mrb[5].mxu0 }
 0x339   :  { %v2120_v48 = vpack.c.bf16 %v2046_v46, %v486_v47  ;;  %v895_v46 = vld [vmem:[%s2999_s8 + $0x38] sm:$0xff] }
 0x33a   :  { %v2810_v47 = vpack.c.bf16 %v895_v46, %v891_v44 }
 0x33b   :  { %v2049_v49 = vpop.f32.mrb[6].mxu0  ;;  %2121 = vmatprep.subr.bf16.mxu1 %v2120_v48 }
 0x33c   :  { %v496_v50 = vpop.f32.mrb[7].mxu0  ;;  %2123 = vmatpush3.bf16.msra.mxu1 %v2120_v48 }
 0x33d   :  { %v2124_v51 = vpack.c.bf16 %v2049_v49, %v496_v50  ;;  %v888_v49 = vld [vmem:[%s2999_s8] sm:$0xff] }
 0x33e   :  { %v892_v50 = vld [vmem:[%s2999_s8 + $0x20] sm:$0xff] }
 0x33f   :  { %2125 = vmatprep.subr.bf16.mxu1 %v2124_v51 }
 0x340   :  { %2127 = vmatpush3.bf16.msra.mxu1 %v2124_v51 }
 0x341   :  { %2135 = vmatprep.subr.bf16.mxu1 %v2134_v56  ;;  %v897_v56 = vld [vmem:[%s2999_s8 + $0x48] sm:$0xff] }
 0x343   :  { %2059 = vmatmul.mubr.msk.f32.vlgmr.msra.gmra.mrb[4].mxu1 %vm278_vm2, %v2763_v12 }
 0x344   :  { %2061 = vmatprep.mubr.msk.f32.mxu1 %vm278_vm2, %v2765_v13  ;;  %2137 = vmatpush1.bf16.msra.mxu1 %v2136_v59  ;;  %v899_v59 = vld [vmem:[%s2999_s8 + $0x58] sm:$0xff] }
 0x345   :  { %2139 = vmatprep.subr.bf16.mxu1 %v2138_v33 }
 0x347   :  { %2062 = vmatmul.mubr.msk.f32.gmra.mrb[6].mxu1 %vm278_vm2, %v2771_v14 }
 0x348   :  { %810 = vmatprep.mubr.f32.mxu1 %v2554_v53  ;;  %2141 = vmatpush1.bf16.msra.mxu1 %v2140_v38 }
 0x349   :  { %2151 = vmatprep.subr.bf16.mxu1 %v2805_v45 }
 0x416   :  { %v2060_v61 = vpop.f32.mrb[4].mxu1 }
 0x417   :  { %v584_v62 = vadd.f32 %v2060_v61, %v1936_v60  ;;  %v578_v63 = vpop.f32.mrb[5].mxu1 }
 0x418   :  { %v579_v0 = vadd.f32 %v1936_v60, %v578_v63  ;;  %v2840_v63 = vpack.c.bf16 %v894_v55, %v890_v54 }
 0x419   :  { %vm598_vm1 = vcmp.ne.f32.partialorder %v584_v62, %v584_v62 }
 0x41a   :  { %v602_v1 = vsel %vm598_vm1, 0.0, %v584_v62  ;;  %vm597_vm3 = vcmp.ne.f32.partialorder %v579_v0, %v579_v0  ;;  %v2063_v2 = vpop.f32.mrb[6].mxu1  ;;  %v2838_v62 = vpack.c.bf16 %v892_v50, %v888_v49 }
 0x41b   :  { %vm606_vm4 = vcmp.eq.f32.partialorder %v602_v1, inf  ;;  %v601_v3 = vsel %vm597_vm3, 0.0, %v579_v0  ;;  %v594_v4 = vadd.f32 %v2063_v2, %v1936_v60  ;;  %v588_v5 = vpop.f32.mrb[7].mxu1  ;;  %v896_v0 = vld [vmem:[%s2999_s8 + $0x40] sm:$0xff] }
 0x41c   :  { %v610_v6 = vsel %vm606_vm4, 100000.0, %v602_v1  ;;  %vm605_vm5 = vcmp.eq.f32.partialorder %v601_v3, inf  ;;  %v589_v7 = vadd.f32 %v1936_v60, %v588_v5  ;;  %v903_v60 = vld [vmem:[%s2999_s8 + $0x78] sm:$0xff]  ;;  %v2845_v1 = vpack.c.bf16 %v901_v58, %v897_v56  ;;  %v902_v5 = vld [vmem:[%s2999_s8 + $0x70] sm:$0xff] }
 0x41d   :  { %vm614_vm6 = vcmp.eq.f32.partialorder %v610_v6, -inf  ;;  %v609_v8 = vsel %vm605_vm5, 100000.0, %v601_v3  ;;  %vm600_vm7 = vcmp.ne.f32.partialorder %v594_v4, %v594_v4  ;;  %v2847_v2 = vpack.c.bf16 %v903_v60, %v899_v59  ;;  %v900_v3 = vld [vmem:[%s2999_s8 + $0x60] sm:$0xff] }
 0x41e   :  { %v618_v9 = vsel %vm614_vm6, -100000.0, %v610_v6  ;;  %vm613_vm8 = vcmp.eq.f32.partialorder %v609_v8, -inf  ;;  %v604_v10 = vsel %vm600_vm7, 0.0, %v594_v4  ;;  %vm599_vm9 = vcmp.ne.f32.partialorder %v589_v7, %v589_v7  ;;  %v898_v4 = vld [vmem:[%s2999_s8 + $0x50] sm:$0xff] }
 0x41f   :  { %v622_v11 = vmax.f32 %v618_v9, 0.0  ;;  %v617_v12 = vsel %vm613_vm8, -100000.0, %v609_v8  ;;  %vm608_vm10 = vcmp.eq.f32.partialorder %v604_v10, inf  ;;  %v603_v13 = vsel %vm599_vm9, 0.0, %v589_v7 }
 0x420   :  { %v621_v14 = vmax.f32 %v617_v12, 0.0  ;;  %v612_v15 = vsel %vm608_vm10, 100000.0, %v604_v10  ;;  %vm607_vm11 = vcmp.eq.f32.partialorder %v603_v13, inf  ;;  %v2862_v7 = vpack.c.bf16 %v900_v3, %v896_v0  ;;  %v721_v12 = vld [vmem:[#allocation13] sm:$0xf] }
 0x421   :  { %vm616_vm12 = vcmp.eq.f32.partialorder %v612_v15, -inf  ;;  %v611_v16 = vsel %vm607_vm11, 100000.0, %v603_v13  ;;  %v2864_v8 = vpack.c.bf16 %v902_v5, %v898_v4  ;;  %v723_v9 = vlaneseq }
 0x422   :  { %v2129_v17 = vpack.c.bf16 %v622_v11, %v621_v14  ;;  %v620_v18 = vsel %vm616_vm12, -100000.0, %v612_v15  ;;  %vm615_vm13 = vcmp.eq.f32.partialorder %v611_v16, -inf  ;;  %vm1745_vm8 = vcmask 293888  }
 0x423   :  { %v624_v21 = vmax.f32 %v620_v18, 0.0  ;;  %v619_v22 = vsel %vm615_vm13, -100000.0, %v611_v16  ;;  %v2886_v10 = vshrl.u32 %v723_v9, 7 }
 0x424   :  { %v623_v23 = vmax.f32 %v619_v22, 0.0  ;;  %2130 = vmatpush3.bf16.msra.mxu0 %v2129_v17 }
 0x425   :  { %2131 = vmatprep.subr.bf16.mxu0 %v2552_v52  ;;  %v725_v11 = vsub.s32 0, %v2886_v10  ;;  %v729_v15 = vsub.s32 1, %v2886_v10  ;;  %v737_v20 = vsub.s32 3, %v2886_v10  ;;  %v733_v30 = vsub.s32 2, %v2886_v10 }
 0x426   :  { %v2132_v27 = vpack.c.bf16 %v624_v21, %v623_v23 }
 0x427   :  { %v726_v18 = vrot.slane %v721_v12, %v725_v11  ;;  %v730_v19 = vrot.slane %v721_v12, %v729_v15  ;;  %v734_v34 = vrot.slane %v721_v12, %v733_v30 }
 0x428   :  { %2133 = vmatpush3.bf16.msra.mxu0 %v2132_v27 }
 0x429   :  { %2143 = vmatprep.subr.bf16.mxu0 %v2142_v24 }
 0x42b   :  { %2073 = vmatmul.mubr.msk.f32.vlgmr.msra.gmra.mrb[8].mxu0 %vm278_vm2, %v625_v28  ;;  %v738_v28 = vrot.slane %v721_v12, %v737_v20 }
 0x42c   :  { %2145 = vmatpush1.bf16.msra.mxu0 %v2144_v29  ;;  %881 = vmatprep.mubr.f32.mxu0 %v2554_v53 }
 0x42d   :  { %2147 = vmatprep.subr.bf16.mxu0 %v2146_v37 }
 0x430   :  { %2149 = vmatpush1.bf16.msra.mxu0 %v2148_v41 }
 0x431   :  { %2159 = vmatprep.subr.bf16.mxu0 %v2810_v47 }
 0x4fe   :  { %v695_v48 = vpop.f32.mrb[8].mxu0 }
 0x4ff   :  { %vm699_vm14 = vcmp.ne.f32.partialorder %v695_v48, %v695_v48  ;;  %v2074_v51 = vpop.f32.mrb[9].mxu0 }
 0x500   :  { %v700_v57 = vsel %vm699_vm14, 0.0, %v695_v48 }
 0x501   :  { %vm701_vm1 = vcmp.eq.f32.partialorder %v700_v57, inf }
 0x502   :  { %v702_v61 = vsel %vm701_vm1, 100000.0, %v700_v57 }
 0x503   :  { %vm703_vm3 = vcmp.eq.f32.partialorder %v702_v61, -inf }
 0x504   :  { %v704_v6 = vsel %vm703_vm3, -100000.0, %v702_v61 }
 0x505   :  { %1942 = vmatmul.mubr.msk.f32.vlgmr.msra.gmra.mrb[8].mxu1 %vm278_vm2, %v704_v6  ;;  %1943 = vmatmul.mubr.msk.f32.vlgmr.msra.gmra.mrb[10].mxu0 %vm278_vm2, %v704_v6 }
 0x506   :  { %2153 = vmatpush1.bf16.msra.mxu1 %v2838_v62  ;;  %2161 = vmatpush1.bf16.msra.mxu0 %v2840_v63 }
 0x507   :  { %2155 = vmatprep.subr.bf16.mxu1 %v2845_v1  ;;  %2163 = vmatprep.subr.bf16.mxu0 %v2847_v2 }
 0x508   :  { %971 = vmatprep.mubr.f32.mxu1 %v2554_v53  ;;  %1042 = vmatprep.mubr.f32.mxu0 %v2554_v53 }
 0x50a   :  { %2157 = vmatpush1.bf16.msra.mxu1 %v2862_v7  ;;  %2165 = vmatpush1.bf16.msra.mxu0 %v2864_v8 }
 0x50b   :  { %2167 = vmatprep.subr.bf16.mxu1 %v2805_v45  ;;  %2175 = vmatprep.subr.bf16.mxu0 %v2810_v47 }
 0x50d   :  { %972 = vmatmul.mubr.f32.vlgmr.msra.gmra.mrb[10].mxu1 %v2554_v53  ;;  %1043 = vmatmul.mubr.f32.vlgmr.msra.gmra.mrb[12].mxu0 %v2554_v53 }
 0x50e   :  { %2169 = vmatpush1.bf16.msra.mxu1 %v2838_v62  ;;  %2177 = vmatpush1.bf16.msra.mxu0 %v2840_v63 }
 0x50f   :  { %2171 = vmatprep.subr.bf16.mxu1 %v2845_v1  ;;  %2179 = vmatprep.subr.bf16.mxu0 %v2847_v2 }
 0x510   :  { %1144 = vmatprep.mubr.f32.mxu1 %v2554_v53  ;;  %1215 = vmatprep.mubr.f32.mxu0 %v2554_v53 }
 0x512   :  { %2173 = vmatpush1.bf16.msra.mxu1 %v2862_v7  ;;  %2181 = vmatpush1.bf16.msra.mxu0 %v2864_v8 }
 0x513   :  { %2183 = vmatprep.subr.bf16.mxu1 %v2805_v45  ;;  %2191 = vmatprep.subr.bf16.mxu0 %v2810_v47 }
 0x5d8   :  { %v812_v13 = vpop.f32.mrb[8].mxu1  ;;  %v883_v14 = vpop.f32.mrb[10].mxu0 }
 0x5d9   :  { %v814_v16 = vpop.f32.mrb[9].mxu1  ;;  %v885_v17 = vpop.f32.mrb[11].mxu0  ;;  %v2893_v21 = vadd.f32 %v812_v13, %v726_v18  ;;  %v2903_v36 = vadd.f32 %v883_v14, %v734_v34 }
 0x5da   :  { %v2895_v22 = vadd.f32 %v814_v16, %v730_v19  ;;  %v2900_v33 = vadd.f32 %v885_v17, %v738_v28 }
 0x5e0   :  { %v973_v23 = vpop.f32.mrb[10].mxu1  ;;  %v1044_v24 = vpop.f32.mrb[12].mxu0 }
 0x5e1   :  { %v1049_v25 = vadd.f32 %v973_v23, %v2893_v21  ;;  %v975_v26 = vpop.f32.mrb[11].mxu1  ;;  %v1046_v27 = vpop.f32.mrb[13].mxu0  ;;  %v1051_v38 = vadd.f32 %v1044_v24, %v2903_v36 }
 0x5e2   :  { %v1050_v29 = vadd.f32 %v975_v26, %v2895_v22  ;;  %v1052_v35 = vadd.f32 %v1046_v27, %v2900_v33 }
 0x5e3   :  { %v1944_v31 = vmul.f32 -1.442695, %v1049_v25 }
 0x5e4   :  { %v1945_v32 = vmul.f32 -1.442695, %v1050_v29  ;;  %v1946_v37 = vmul.f32 -1.442695, %v1052_v35 }
 0x5e5   :  { %2243 = vpow2.f32 %v1944_v31 }
 0x5e6   :  { %2245 = vpow2.f32 %v1945_v32 }
 0x5e7   :  { %2247 = vpow2.f32 %v1946_v37 }
 0x5e8   :  { %2249 = vtanh.f32 %v1051_v38 }
 0x5ef   :  { %v2244_v39 = vpop.eup %2243 }
 0x5f0   :  { %v2246_v40 = vpop.eup %2245  ;;  %v1056_v41 = vadd.f32 1.0, %v2244_v39 }
 0x5f1   :  { %v1062_v42 = vadd.f32 1.0, %v2246_v40  ;;  %v2248_v43 = vpop.eup %2247 }
 0x5f2   :  { %2251 = vrcp.f32 %v1056_v41  ;;  %v2250_v44 = vpop.eup %2249  ;;  %v1069_v50 = vadd.f32 1.0, %v2248_v43 }
 0x5f3   :  { %2253 = vrcp.f32 %v1062_v42 }
 0x5f4   :  { %2255 = vrcp.f32 %v1069_v50 }
 0x5fc   :  { %v2252_v46 = vpop.eup %2251 }
 0x5fd   :  { %v2254_v48 = vpop.eup %2253  ;;  %v1073_v49 = vmul.f32 %v2252_v46, %v2250_v44 }
 0x5fe   :  { %v1072_v51 = vmul.f32 0.0, %v2254_v48  ;;  %v2256_v55 = vpop.eup %2255 }
 0x600   :  { %v1074_v54 = vadd.f32 %v1073_v49, %v1072_v51 }
 0x602   :  { %2257 = vtanh.f32 %v1074_v54  ;;  %v1258_v24 = vrot.slane %v1074_v54, 7 }
 0x60c   :  { %v2258_v56 = vpop.eup %2257 }
 0x60d   :  { %v1076_v57 = vmul.f32 %v2258_v56, %v2256_v55 }
 0x60f   :  { %1947 = vmatmul.mubr.msk.f32.vlgmr.msra.gmra.mrb[12].mxu1 %vm278_vm2, %v1076_v57  ;;  %1948 = vmatmul.mubr.msk.f32.vlgmr.msra.gmra.mrb[14].mxu0 %vm278_vm2, %v1076_v57 }
 0x610   :  { %2185 = vmatpush1.bf16.msra.mxu1 %v2838_v62  ;;  %2193 = vmatpush1.bf16.msra.mxu0 %v2840_v63 }
 0x611   :  { %2187 = vmatprep.subr.bf16.mxu1 %v2845_v1  ;;  %2195 = vmatprep.subr.bf16.mxu0 %v2847_v2 }
 0x612   :  { %1333 = vmatprep.mubr.f32.mxu1 %v2554_v53  ;;  %1404 = vmatprep.mubr.f32.mxu0 %v2554_v53 }
 0x614   :  { %2189 = vmatpush1.bf16.msra.mxu1 %v2862_v7  ;;  %2197 = vmatpush1.bf16.msra.mxu0 %v2864_v8 }
 0x615   :  { %2199 = vmatprep.subr.bf16.mxu1 %v2805_v45  ;;  %2207 = vmatprep.subr.bf16.mxu0 %v2810_v47 }
 0x6e2   :  { %v1146_v58 = vpop.f32.mrb[12].mxu1  ;;  %v1217_v59 = vpop.f32.mrb[14].mxu0 }
 0x6e3   :  { %v1226_v60 = vrot.slane %v1146_v58, 7  ;;  %v1148_v61 = vpop.f32.mrb[13].mxu1  ;;  %v1219_v0 = vpop.f32.mrb[15].mxu0  ;;  %v1228_v45 = vrot.slane %v1217_v59, 7 }
 0x6e4   :  { %v1227_v3 = vrot.slane %v1148_v61, 7  ;;  %v1229_v12 = vrot.slane %v1219_v0, 7 }
 0x6e5   :  { %v1234_v4 = vadd.f32 %v1226_v60, %v2893_v21  ;;  %v1236_v47 = vadd.f32 %v1228_v45, %v2903_v36  ;;  %v1652_v45 = vld [vmem:[#allocation14 + $0x18] sm:$0xff] }
 0x6e6   :  { %v1235_v5 = vadd.f32 %v1227_v3, %v2895_v22  ;;  %v1237_v13 = vadd.f32 %v1229_v12, %v2900_v33  ;;  %v1651_v12 = vld [vmem:[#allocation14 + $0x10] sm:$0xff] }
 0x6e7   :  { %v1949_v6 = vmul.f32 -1.442695, %v1234_v4 }
 0x6e8   :  { %v1950_v9 = vmul.f32 -1.442695, %v1235_v5  ;;  %v1951_v14 = vmul.f32 -1.442695, %v1237_v13 }
 0x6e9   :  { %2259 = vpow2.f32 %v1949_v6  ;;  %v1649_v6 = vld [vmem:[#allocation14] sm:$0xff] }
 0x6ea   :  { %2261 = vpow2.f32 %v1950_v9  ;;  %v1650_v9 = vld [vmem:[#allocation14 + $0x8] sm:$0xff] }
 0x6eb   :  { %2263 = vpow2.f32 %v1951_v14  ;;  %v2215_v13 = vpack.c.bf16 %v1650_v9, %v1649_v6  ;;  %v2218_v14 = vpack.c.bf16 %v1652_v45, %v1651_v12 }
 0x6ec   :  { %2265 = vtanh.f32 %v1236_v47 }
 0x6f3   :  { %v2260_v15 = vpop.eup %2259 }
 0x6f4   :  { %v2262_v16 = vpop.eup %2261  ;;  %v1241_v17 = vadd.f32 1.0, %v2260_v15 }
 0x6f5   :  { %v1247_v18 = vadd.f32 1.0, %v2262_v16  ;;  %v2264_v19 = vpop.eup %2263 }
 0x6f6   :  { %2267 = vrcp.f32 %v1241_v17  ;;  %v2266_v20 = vpop.eup %2265  ;;  %v1254_v27 = vadd.f32 1.0, %v2264_v19 }
 0x6f7   :  { %2269 = vrcp.f32 %v1247_v18 }
 0x6f8   :  { %2271 = vrcp.f32 %v1254_v27 }
 0x700   :  { %v2268_v23 = vpop.eup %2267 }
 0x701   :  { %v2270_v25 = vpop.eup %2269  ;;  %v1261_v26 = vmul.f32 %v2268_v23, %v2266_v20 }
 0x702   :  { %v1260_v28 = vmul.f32 %v2270_v25, %v1258_v24  ;;  %v2272_v30 = vpop.eup %2271 }
 0x704   :  { %v1262_v29 = vadd.f32 %v1261_v26, %v1260_v28 }
 0x706   :  { %2273 = vtanh.f32 %v1262_v29  ;;  %v1447_v56 = vrot.slane %v1262_v29, 7 }
 0x710   :  { %v2274_v31 = vpop.eup %2273 }
 0x711   :  { %v1264_v32 = vmul.f32 %v2274_v31, %v2272_v30 }
 0x713   :  { %v1266_v34 = vrot.slane %v1264_v32, 1 }
 0x715   :  { %1952 = vmatmul.mubr.msk.f32.vlgmr.msra.gmra.mrb[14].mxu1 %vm278_vm2, %v1266_v34  ;;  %1953 = vmatmul.mubr.msk.f32.vlgmr.msra.gmra.mrb[16].mxu0 %vm278_vm2, %v1266_v34 }
 0x716   :  { %2201 = vmatpush1.bf16.msra.mxu1 %v2838_v62  ;;  %2209 = vmatpush1.bf16.msra.mxu0 %v2840_v63 }
 0x717   :  { %2203 = vmatprep.subr.bf16.mxu1 %v2845_v1  ;;  %2211 = vmatprep.subr.bf16.mxu0 %v2847_v2 }
 0x718   :  { %1522 = vmatprep.mubr.f32.mxu1 %v2554_v53  ;;  %1593 = vmatprep.mubr.f32.mxu0 %v2554_v53 }
 0x71a   :  { %2205 = vmatpush1.bf16.msra.mxu1 %v2862_v7  ;;  %2213 = vmatpush1.bf16.msra.mxu0 %v2864_v8 }
 0x71b   :  { %2214 = vmatprep.subr.bf16.mxu1 %v2552_v52  ;;  %2220 = vmatprep.subr.bf16.mxu0 %v2552_v52 }
 0x7e8   :  { %v1335_v35 = vpop.f32.mrb[14].mxu1  ;;  %v1406_v62 = vpop.f32.mrb[16].mxu0 }
 0x7e9   :  { %v1415_v37 = vrot.slane %v1335_v35, 6  ;;  %v1337_v63 = vpop.f32.mrb[15].mxu1  ;;  %v1408_v38 = vpop.f32.mrb[17].mxu0  ;;  %v1417_v8 = vrot.slane %v1406_v62, 6 }
 0x7ea   :  { %v1416_v1 = vrot.slane %v1337_v63, 6  ;;  %v1418_v42 = vrot.slane %v1408_v38, 6 }
 0x7eb   :  { %v1423_v2 = vadd.f32 %v1415_v37, %v2893_v21  ;;  %v1425_v44 = vadd.f32 %v1417_v8, %v2903_v36 }
 0x7ec   :  { %v1424_v39 = vadd.f32 %v1416_v1, %v2895_v22  ;;  %v1426_v7 = vadd.f32 %v1418_v42, %v2900_v33 }
 0x7ed   :  { %v1954_v40 = vmul.f32 -1.442695, %v1423_v2 }
 0x7ee   :  { %v1955_v41 = vmul.f32 -1.442695, %v1424_v39  ;;  %v1956_v43 = vmul.f32 -1.442695, %v1426_v7 }
 0x7ef   :  { %2275 = vpow2.f32 %v1954_v40 }
 0x7f0   :  { %2277 = vpow2.f32 %v1955_v41 }
 0x7f1   :  { %2279 = vpow2.f32 %v1956_v43  ;;  %v1740_v43 = vld [vmem:[%s3004_s13] sm:$0xff] }
 0x7f2   :  { %2281 = vtanh.f32 %v1425_v44  ;;  %v1741_v44 = vld [vmem:[%s3004_s13 + $0x8] sm:$0xff] }
 0x7f9   :  { %v2276_v46 = vpop.eup %2275 }
 0x7fa   :  { %v2278_v48 = vpop.eup %2277  ;;  %v1430_v49 = vadd.f32 1.0, %v2276_v46  ;;  %v2221_v46 = vpack.c.bf16 %v1741_v44, %v1740_v43 }
 0x7fb   :  { %v1436_v50 = vadd.f32 1.0, %v2278_v48  ;;  %v2280_v51 = vpop.eup %2279  ;;  %v1742_v48 = vld [vmem:[%s3004_s13 + $0x10] sm:$0xff] }
 0x7fc   :  { %2283 = vrcp.f32 %v1430_v49  ;;  %v2282_v54 = vpop.eup %2281  ;;  %v1443_v59 = vadd.f32 1.0, %v2280_v51  ;;  %v1743_v49 = vld [vmem:[%s3004_s13 + $0x18] sm:$0xff]  ;;  %v1744_v51 = vld [vmem:[%s3004_s13 + $0x20] sm:$0xf]  ;;  %s2555_s13 = smov [#allocation17]  }
 0x7fd   :  { %2285 = vrcp.f32 %v1436_v50  ;;  %v2224_v50 = vpack.c.bf16 %v1743_v49, %v1742_v48  ;;  %s1909_s15 = sshll.u32 %s2555_s13, 4  ;;  %s1910_s15 = int_to_ptr.vmem [resolvable:$true] %s1909_s15 }
 0x7fe   :  { %2287 = vrcp.f32 %v1443_v59  ;;  %p2510_p3 = scmp.lt.s32.totalorder %s1910_s15, %s1910_s15 }
 0x806   :  { %v2284_v55 = vpop.eup %2283 }
 0x807   :  { %v2286_v57 = vpop.eup %2285  ;;  %v1450_v58 = vmul.f32 %v2284_v55, %v2282_v54  ;;  %v1653_v54 = vld [vmem:[#allocation16] sm:$0x1] }
 0x808   :  { %v1449_v60 = vmul.f32 %v2286_v57, %v1447_v56  ;;  %v2288_v0 = vpop.eup %2287 }
 0x80a   :  { %v1451_v61 = vadd.f32 %v1450_v58, %v1449_v60 }
 0x80c   :  { %2289 = vtanh.f32 %v1451_v61  ;;  %v1636_v37 = vrot.slane %v1451_v61, 7 }
 0x816   :  { %v2290_v3 = vpop.eup %2289 }
 0x817   :  { %v1453_v4 = vmul.f32 %v2290_v3, %v2288_v0 }
 0x819   :  { %v1455_v5 = vrot.slane %v1453_v4, 2 }
 0x81b   :  { %1957 = vmatmul.mubr.msk.f32.vlgmr.msra.gmra.mrb[16].mxu1 %vm278_vm2, %v1455_v5  ;;  %1958 = vmatmul.mubr.msk.f32.vlgmr.msra.gmra.mrb[18].mxu0 %vm278_vm2, %v1455_v5 }
 0x81c   :  { %2083 = vmatprep.mubr.msk.f32.mxu1 %vm2553_vm15, %v2554_v53  ;;  %2096 = vmatprep.mubr.msk.f32.mxu0 %vm2553_vm15, %v2554_v53 }
 0x81d   :  { %2216 = vmatpush3.bf16.msra.mxu1 %v2215_v13  ;;  %2222 = vmatpush3.bf16.msra.mxu0 %v2221_v46 }
 0x81e   :  { %2217 = vmatprep.subr.bf16.mxu1 %v2552_v52  ;;  %2223 = vmatprep.subr.bf16.mxu0 %v2552_v52 }
 0x821   :  { %2219 = vmatpush3.bf16.msra.mxu1 %v2218_v14  ;;  %2225 = vmatpush3.bf16.msra.mxu0 %v2224_v50 }
 0x822   :  { %2099 = vmatprep.subr.mxu1 %v2554_v53  ;;  %2094 = vmatprep.subr.mxu0 %v2554_v53 }
 0x825   :  { %2095 = vmatpush3.msk.msra.mxu0 %vm182_vm0, %v1744_v51  ;;  %vm1822_vm0 = vcmask 64512  }
 0x8ee   :  { %v1524_v47 = vpop.f32.mrb[16].mxu1  ;;  %v1595_v15 = vpop.f32.mrb[18].mxu0 }
 0x8ef   :  { %v1604_v16 = vrot.slane %v1524_v47, 5  ;;  %v1526_v17 = vpop.f32.mrb[17].mxu1  ;;  %v1597_v18 = vpop.f32.mrb[19].mxu0  ;;  %v1606_v28 = vrot.slane %v1595_v15, 5 }
 0x8f0   :  { %v1605_v19 = vrot.slane %v1526_v17, 5  ;;  %v1607_v26 = vrot.slane %v1597_v18, 5 }
 0x8f1   :  { %v1612_v20 = vadd.f32 %v1604_v16, %v2893_v21  ;;  %v1614_v30 = vadd.f32 %v1606_v28, %v2903_v36 }
 0x8f2   :  { %v1613_v23 = vadd.f32 %v1605_v19, %v2895_v22  ;;  %v1615_v27 = vadd.f32 %v1607_v26, %v2900_v33 }
 0x8f3   :  { %v1959_v24 = vmul.f32 -1.442695, %v1612_v20 }
 0x8f4   :  { %v1960_v25 = vmul.f32 -1.442695, %v1613_v23  ;;  %v1961_v29 = vmul.f32 -1.442695, %v1615_v27 }
 0x8f5   :  { %2291 = vpow2.f32 %v1959_v24 }
 0x8f6   :  { %2293 = vpow2.f32 %v1960_v25 }
 0x8f7   :  { %2295 = vpow2.f32 %v1961_v29 }
 0x8f8   :  { %2297 = vtanh.f32 %v1614_v30 }
 0x8ff   :  { %v2292_v31 = vpop.eup %2291 }
 0x900   :  { %v2294_v32 = vpop.eup %2293  ;;  %v1619_v34 = vadd.f32 1.0, %v2292_v31 }
 0x901   :  { %v1625_v35 = vadd.f32 1.0, %v2294_v32  ;;  %v2296_v21 = vpop.eup %2295 }
 0x902   :  { %2299 = vrcp.f32 %v1619_v34  ;;  %v2298_v22 = vpop.eup %2297  ;;  %v1632_v1 = vadd.f32 1.0, %v2296_v21 }
 0x903   :  { %2301 = vrcp.f32 %v1625_v35 }
 0x904   :  { %2303 = vrcp.f32 %v1632_v1 }
 0x90c   :  { %v2300_v62 = vpop.eup %2299 }
 0x90d   :  { %v2302_v63 = vpop.eup %2301  ;;  %v1639_v38 = vmul.f32 %v2300_v62, %v2298_v22 }
 0x90e   :  { %v1638_v33 = vmul.f32 %v2302_v63, %v1636_v37  ;;  %v2304_v36 = vpop.eup %2303 }
 0x910   :  { %v1640_v2 = vadd.f32 %v1639_v38, %v1638_v33 }
 0x912   :  { %2305 = vtanh.f32 %v1640_v2 }
 0x91c   :  { %v2306_v39 = vpop.eup %2305 }
 0x91d   :  { %v1642_v40 = vmul.f32 %v2306_v39, %v2304_v36 }
 0x91f   :  { %vm1643_vm4 = vcmp.ne.f32.partialorder %v1642_v40, %v1642_v40 }
 0x920   :  { %v1644_v41 = vsel %vm1643_vm4, 0.0, %v1642_v40 }
 0x921   :  { %vm1645_vm5 = vcmp.eq.f32.partialorder %v1644_v41, inf }
 0x922   :  { %v1646_v42 = vsel %vm1645_vm5, 100000.0, %v1644_v41 }
 0x923   :  { %vm1647_vm6 = vcmp.eq.f32.partialorder %v1646_v42, -inf }
 0x924   :  { %v1648_v7 = vsel %vm1647_vm6, -100000.0, %v1646_v42 }
 0x925   :  { %v1655_v8 = vrot.slane %v1648_v7, 3 }
 0x927   :  { %2084 = vmatmul.mubr.msk.f32.vlgmr.msra.gmra.mrb[18].mxu1 %vm278_vm2, %v1655_v8 }
 0x928   :  { %2101 = vmatprep.mubr.msk.f32.mxu1 %vm2553_vm15, %v2554_v53  ;;  %v1734_v53 = vld [vmem:[%s3003_s12] sm:$0xff]  ;;  %s2505_s12 = scalar_lea.vmem %s1910_s15, 128 }
 0x929   :  { %p2506_p2 = scmp.ne.s32.totalorder %s1910_s15, %s2505_s12  ;;  %p2511_p4 = scmp.lt.s32.totalorder %s2505_s12, %s2505_s12 }
 0x92b   :  { %p2512_p5 = por %p2511_p4, %p2510_p3 }
 0x92d   :  { %p2513_p6 = pnand %p2512_p5, %p2506_p2 }
 0x9fa   :  { %v1724_v52 = vpop.f32.mrb[18].mxu1 }
 0x9fb   :  { %v1725_v55 = vadd.f32 %v1724_v52, %v1653_v54  ;;  %v2085_v56 = vpop.f32.mrb[19].mxu1 }
 0x9fd   :  { %vm1728_vm2 = vcmp.ne.f32.partialorder %v1725_v55, %v1725_v55 }
 0x9fe   :  { %v1729_v57 = vsel %vm1728_vm2, 0.0, %v1725_v55 }
 0x9ff   :  { %vm1730_vm15 = vcmp.eq.f32.partialorder %v1729_v57, inf }
 0xa00   :  { %v1731_v58 = vsel %vm1730_vm15, 100000.0, %v1729_v57 }
 0xa01   :  { %vm1732_vm7 = vcmp.eq.f32.partialorder %v1731_v58, -inf }
 0xa02   :  { %v1733_v59 = vsel %vm1732_vm7, -100000.0, %v1731_v58 }
 0xa03   :  { %v1738_v60 = vrot.slane %v1733_v59, %v725_v11 }
 0xa05   :  { %v1739_v61 = vmul.f32 %v1738_v60, %v1734_v53 }
 0xa07   :  { %2097 = vmatmul.mubr.msk.f32.vlgmr.msra.gmra.mrb[20].mxu0 %vm1745_vm8, %v1739_v61 }
 0xada   :  { %v1818_v0 = vpop.f32.mrb[20].mxu0 }
 0xadb   :  { %v2098_v3 = vpop.f32.mrb[21].mxu0  ;;  %2100 = vmatpush3.xpose.msk.msra.mxu1 %vm1822_vm0, %v1818_v0 }
 0xade   :  { %2102 = vmatmul.mubr.msk.f32.vlgmr.msra.gmra.mrb[20].mxu1 %vm1822_vm0, %v1818_v0 }
 0xbb1   :  { %v1892_v4 = vpop.f32.mrb[20].mxu1 }
 0xbb2   :  { %vm1896_vm9 = vcmp.ne.f32.partialorder %v1892_v4, %v1892_v4  ;;  %v2103_v5 = vpop.f32.mrb[21].mxu1 }
 0xbb3   :  { %v1897_v6 = vsel %vm1896_vm9, 0.0, %v1892_v4 }
 0xbb4   :  { %vm1898_vm10 = vcmp.eq.f32.partialorder %v1897_v6, inf }
 0xbb5   :  { %v1899_v9 = vsel %vm1898_vm10, 100000.0, %v1897_v6 }
 0xbb6   :  { %vm1900_vm11 = vcmp.eq.f32.partialorder %v1899_v9, -inf }
 0xbb7   :  { %v1901_v10 = vsel %vm1900_vm11, -100000.0, %v1899_v9 }
 0xbb8   :  { %1902 = vst.msk [vmem:[#allocation17] sm:$0xff] %vm1822_vm0, %v1901_v10 }
 0xbb9   :  { %2516 = shalt.err (!%p2513_p6)
}
 0xbba   :  { %s2517_s16 = scalar_lea.hbm %s3005_s14, 128 }
 0xbbb   :  { %p2518_p7 = scmp.ne.s32.totalorder %s3005_s14, %s2517_s16  ;;  %p2521_p8 = scmp.lt.u32.totalorder %s2517_s16, %s3005_s14 }
 0xbbd   :  { %p2523_p9 = pnand %p2521_p8, %p2518_p7 }
 0xbbf   :  { %2526 = shalt.err (!%p2523_p9)
}
 0xbc0   :  { %1912 = dma.vmem_to_hbm [thread:$0]  %s1910_s15, 128, %s3005_s14, [#allocation4]  }
 0xbc1   :  { %2537 = dma.done.wait [#allocation4], 128  }
 0xbc2   :  { %2538 = vsyncadd [#allocation4], 4294967168 }
 0xbc3   :  { %1916 = vsyncpa [#allocation3], 1 }
 0xbc4   :  { %1917 = vsyncpa [#allocation6], 1 }
 0xbc5   :  { %1918 = vsyncpa [#allocation9], 1 }
 0xbc6   :  { %1919 = vsyncpa [#allocation12], 1 }
 0xbc7   :  { %1920 = vsyncpa [#allocation15], 1 }
 0xbc8   :  { %1921 = vsyncpa [#allocation4], 1 }

</bundles_post_ra>
